<compile_context>
chip_gen: v7x
topology: tpu7x:2x2x1
jax: 0.10.0
libtpu: 0.0.40
codegen_flags: <defaults>
</compile_context>

<pallas_src>
import functools

import jax
import jax.numpy as jnp
from jax.experimental import pallas as pl
from jax.experimental.pallas import tpu as pltpu


# ------------------------- small helpers -------------------------

def _cdiv(a, b):
    return (a + b - 1) // b


def _round_up(a, b):
    return _cdiv(a, b) * b


_SMALL_M = 32  # below this many GEMM rows, skip Pallas (launch cost > math)


def _num_tensorcores():
    """Best-effort TensorCore count (v7x has 2/chip); defaults to 1."""
    try:
        d = jax.devices()[0]
        for attr in ("num_cores", "core_count"):
            nc = getattr(d, attr, None)
            if nc:
                return int(nc)
    except Exception:
        pass
    return 1


# ------------------------- fused GEMM Pallas kernel -------------------------

def _gemm_kernel(x_ref, w_ref, b_ref, *refs, act, with_stats):
    """acc = x @ w (f32);  out = act(acc + bias);  optional per-channel
    sum / sum-of-squares of acc (pre-bias; stats layers have zero bias)."""
    if with_stats:
        o_ref, st_ref, acc_ref = refs
    else:
        o_ref, acc_ref = refs

    k = pl.program_id(3)

    @pl.when(k == 0)
    def _():
        acc_ref[...] = jnp.zeros_like(acc_ref)

    acc_ref[...] += jnp.dot(x_ref[0, :, :], w_ref[0, :, :],
                            preferred_element_type=jnp.float32)

    @pl.when(k == pl.num_programs(3) - 1)
    def _():
        acc = acc_ref[...]
        y = acc + b_ref[...]                       # (tm,tn) + (1,tn)
        if act == "leaky_relu":
            y = jnp.where(y >= 0, y, 0.2 * y)
        elif act == "relu":
            y = jnp.maximum(y, 0.0)
        elif act == "tanh":
            y = jnp.tanh(y)
        o_ref[0, :, :] = y.astype(o_ref.dtype)
        if with_stats:
            st = jnp.concatenate(
                [jnp.sum(acc, axis=0, keepdims=True),
                 jnp.sum(acc * acc, axis=0, keepdims=True)], axis=0)
            st_ref[0, 0:2, :] = st                 # rows 0/1: sum / sumsq


def _apply_act(y, act):
    if act == "leaky_relu":
        return jnp.where(y >= 0, y, 0.2 * y)
    if act == "relu":
        return jnp.maximum(y, 0.0)
    if act == "tanh":
        return jnp.tanh(y)
    return y


def fused_gemm(x, w_pad, b_pad, n_out, *, act="none", with_stats=False,
               out_dtype=jnp.bfloat16):
    """Per-phase GEMM: x (P, M, K) @ w_pad (P, Kp, Np) + bias, fused activation.

    w_pad / b_pad are pre-padded/pre-cast at parameter-build time.
    Returns y (P, M, n_out) [+ per-channel sum, sumsq of the pre-bias GEMM].
    """
    P, M, K = x.shape
    _, Kp, Np = w_pad.shape

    if M < _SMALL_M:
        # Tiny bottleneck GEMM: a handful of MXU passes; plain XLA dot is faster
        # than pallas_call launch + padding + pipeline setup.
        acc = jnp.einsum("pmk,pkn->pmn", x.astype(jnp.bfloat16),
                         w_pad[:, :K, :n_out],
                         preferred_element_type=jnp.float32)
        y = _apply_act(acc + b_pad[:, :n_out], act).astype(out_dtype)
        if with_stats:
            return y, jnp.sum(acc, axis=(0, 1)), jnp.sum(acc * acc, axis=(0, 1))
        return y

    # ----- tile selection -----
    tm = min(512, _round_up(M, 16))
    if _num_tensorcores() >= 2 and M >= 512 and _cdiv(M, tm) == 1:
        tm = _round_up(_cdiv(M, 2), 16)            # 2-way M split only on 2-TC parts
    Mp = _round_up(M, tm)
    n_m = Mp // tm

    tn = Np if Np <= 512 else (512 if Np % 512 == 0 else
                               (256 if Np % 256 == 0 else 128))
    n_n = Np // tn

    if Kp <= 512:
        tk = Kp
    elif Kp % 512 == 0:
        tk = 512
    elif Kp % 256 == 0:
        tk = 256
    else:
        tk = 128
    nk = Kp // tk

    xp = jnp.pad(x.astype(jnp.bfloat16), ((0, 0), (0, Mp - M), (0, Kp - K)))

    out_shapes = [jax.ShapeDtypeStruct((P, Mp, Np), out_dtype)]
    out_specs = [pl.BlockSpec((1, tm, tn), lambda p, i, j, k: (p, i, j))]
    if with_stats:
        out_shapes.append(jax.ShapeDtypeStruct((P, n_m * 8, Np), jnp.float32))
        out_specs.append(pl.BlockSpec((1, 8, tn), lambda p, i, j, k: (p, i, j)))

    # VMEM limit from the actual tile footprint (double-buffered in/out + acc).
    o_item = jnp.dtype(out_dtype).itemsize
    vmem = (2 * (tm * tk * 2 + tk * tn * 2 + tn * 4 + tm * tn * o_item
                 + (8 * tn * 4 if with_stats else 0)) + tm * tn * 4)
    vmem_limit = min(100 * 1024 * 1024,
                     max(16 * 1024 * 1024, int(vmem * 1.5) + (4 << 20)))

    outs = pl.pallas_call(
        functools.partial(_gemm_kernel, act=act, with_stats=with_stats),
        out_shape=tuple(out_shapes),
        grid=(P, n_m, n_n, nk),
        in_specs=[
            pl.BlockSpec((1, tm, tk), lambda p, i, j, k: (p, i, k)),
            pl.BlockSpec((1, tk, tn), lambda p, i, j, k: (p, k, j)),
            pl.BlockSpec((1, tn), lambda p, i, j, k: (0, j)),
        ],
        out_specs=tuple(out_specs),
        scratch_shapes=[pltpu.VMEM((tm, tn), jnp.float32)],
        compiler_params=pltpu.CompilerParams(
            dimension_semantics=("parallel", "parallel", "parallel", "arbitrary"),
            vmem_limit_bytes=vmem_limit),
    )(xp, w_pad, b_pad)

    y = outs[0][:, :M, :n_out]
    if not with_stats:
        return y
    st = outs[1].reshape(P, n_m, 8, Np)
    psum = jnp.sum(st[:, :, 0, :n_out], axis=(0, 1))
    psq = jnp.sum(st[:, :, 1, :n_out], axis=(0, 1))
    return y, psum, psq


# ------------------------- conv glue (plain JAX, fused by XLA) -------------------------

def _affine_act(x, s, t, act):
    """Deferred per-channel affine (BatchNorm) + activation; kept in bf16 so it
    fuses into the patch-prep producer without an f32 round trip."""
    y = x.astype(jnp.bfloat16)
    if s is not None:
        y = y * s.astype(jnp.bfloat16) + t.astype(jnp.bfloat16)
    if act == "leaky_relu":
        y = jnp.where(y >= 0, y, y * 0.2)
    elif act == "relu":
        y = jnp.maximum(y, 0.0)
    return y


# TODO(synk): the im2col patch tensor is still materialized in HBM; an in-kernel
# strided-DMA gather (memory_space=pl.ANY + make_async_copy) would remove it.
def conv_down(x_t, pre_act, w_pad, b_pad, cout, *, with_stats):
    """Conv2d(k=4,s=2,p=1). x_t = (raw NHWC, scale, shift) deferred affine."""
    raw, s, t = x_t
    xa = _affine_act(raw, s, t, pre_act)
    n, h, w, c = xa.shape
    ho, wo = h // 2, w // 2
    xp = jnp.pad(xa, ((0, 0), (1, 1), (1, 1), (0, 0)))
    pats = [xp[:, ki:ki + 2 * ho:2, kj:kj + 2 * wo:2, :]
            for ki in range(4) for kj in range(4)]
    pat = jnp.concatenate(pats, axis=-1).reshape(1, n * ho * wo, 16 * c)
    if with_stats:
        y, ps, pq = fused_gemm(pat, w_pad, b_pad, cout, act="none",
                               with_stats=True)
        return y.reshape(n, ho, wo, cout), ps, pq, n * ho * wo
    y = fused_gemm(pat, w_pad, b_pad, cout, act="none", with_stats=False)
    return y.reshape(n, ho, wo, cout)


# (input offset, kernel tap) pairs for the two output phases of
# ConvTranspose2d(k=4, s=2, p=1):  out[2i+r] = sum_{(d,k) in taps[r]} x[i+d]*w[k]
_CT_TAPS = (((-1, 3), (0, 1)),   # phase r=0
            ((0, 2), (1, 0)))    # phase r=1


def conv_up(x_t, w_pad, b_pad, cout, *, out_act="none", with_stats,
            out_dtype=jnp.bfloat16):
    """ConvTranspose2d(k=4,s=2,p=1) via 4 sub-pixel 2x2 convs, all phases in
    ONE pallas_call. uprelu is fused into the patch prep."""
    raw, s, t = x_t
    xa = _affine_act(raw, s, t, "relu")            # uprelu
    n, h, w, c = xa.shape
    xp = jnp.pad(xa, ((0, 0), (1, 1), (1, 1), (0, 0)))
    phases = []
    for r in range(2):
        for cph in range(2):
            parts = [xp[:, dy + 1:dy + 1 + h, dx + 1:dx + 1 + w, :]
                     for dy, _ in _CT_TAPS[r] for dx, _ in _CT_TAPS[cph]]
            phases.append(jnp.concatenate(parts, axis=-1)
                          .reshape(n * h * w, 4 * c))
    pat = jnp.stack(phases, axis=0)                # (4, n*h*w, 4*Cin)

    res = fused_gemm(pat, w_pad, b_pad, cout, act=out_act,
                     with_stats=with_stats, out_dtype=out_dtype)
    yph = res[0] if with_stats else res            # (4, n*h*w, cout)

    # sub-pixel interleave: phase p = 2*r + c  ->  out[:, 2i+r, 2j+c, :]
    y = yph.reshape(2, 2, n, h, w, cout)
    y = jnp.transpose(y, (2, 3, 0, 4, 1, 5)).reshape(n, 2 * h, 2 * w, cout)
    if with_stats:
        return y, res[1], res[2], n * 4 * h * w
    return y


# ------------------------- parameter construction (deterministic) -------------------------

def _init_conv(key, cout, cin, use_bias, k=4, scale=0.05):
    kw, kb = jax.random.split(key)
    w = jax.random.normal(kw, (cout, cin, k, k), jnp.float32) * scale
    b = (jax.random.normal(kb, (cout,), jnp.float32) * scale
         if use_bias else jnp.zeros((cout,), jnp.float32))
    return w, b


def _init_convT(key, cin, cout, use_bias, k=4, scale=0.05):
    kw, kb = jax.random.split(key)
    w = jax.random.normal(kw, (cin, cout, k, k), jnp.float32) * scale
    b = (jax.random.normal(kb, (cout,), jnp.float32) * scale
         if use_bias else jnp.zeros((cout,), jnp.float32))
    return w, b


def _pad_gemm_weight(mats, bias):
    """mats: list of (K, N) f32 GEMM weights (one per phase).
    Pad once at build time: K,N -> multiples of 128, bf16 weights, (1,Np) f32 bias."""
    K, N = mats[0].shape
    Kp, Np = _round_up(K, 128), _round_up(N, 128)
    w = jnp.stack(mats, axis=0)
    w = jnp.pad(w, ((0, 0), (0, Kp - K), (0, Np - N))).astype(jnp.bfloat16)
    b = jnp.pad(bias.astype(jnp.float32).reshape(1, N), ((0, 0), (0, Np - N)))
    return w, b


def _down_gemm_weights(w, b):
    """(Cout, Cin, 4, 4) -> (1, Kp, Np) bf16 GEMM weight + padded bias."""
    wm = jnp.transpose(w, (2, 3, 1, 0)).reshape(-1, w.shape[0])
    return _pad_gemm_weight([wm], b)


def _up_gemm_weights(w, b):
    """(Cin, Cout, 4, 4) -> (4, Kp, Np) bf16 stacked sub-pixel phase weights."""
    cin, cout = w.shape[0], w.shape[1]
    mats = []
    for r in range(2):
        for c in range(2):
            taps = [w[:, :, ky, kx]
                    for _, ky in _CT_TAPS[r] for _, kx in _CT_TAPS[c]]
            mats.append(jnp.stack(taps, axis=0).reshape(4 * cin, cout))
    return _pad_gemm_weight(mats, b)


def build_block(key, outer_nc, inner_nc, input_nc=None, submodule=None,
                outermost=False, innermost=False):
    """Mirrors UnetSkipConnectionBlock.__init__ with norm_layer=BatchNorm2d."""
    if input_nc is None:
        input_nc = outer_nc
    use_bias = False  # BatchNorm2d => conv bias disabled (outermost upconv keeps bias)
    k0, k1 = jax.random.split(key)
    p = {"outermost": outermost, "innermost": innermost, "submodule": submodule}
    dw, db = _init_conv(k0, inner_nc, input_nc, use_bias)
    p["down_w"], p["down_b"] = _down_gemm_weights(dw, db)
    p["down_cout"] = inner_nc
    if outermost:
        uw, ub = _init_convT(k1, inner_nc * 2, outer_nc, True)
    elif innermost:
        uw, ub = _init_convT(k1, inner_nc, outer_nc, use_bias)
    else:
        uw, ub = _init_convT(k1, inner_nc * 2, outer_nc, use_bias)
    p["up_w"], p["up_b"] = _up_gemm_weights(uw, ub)
    p["up_cout"] = outer_nc
    if not outermost:
        p["upnorm_g"] = jnp.ones((outer_nc,), jnp.float32)
        p["upnorm_b"] = jnp.zeros((outer_nc,), jnp.float32)
    if (not outermost) and (not innermost):
        p["downnorm_g"] = jnp.ones((inner_nc,), jnp.float32)
        p["downnorm_b"] = jnp.zeros((inner_nc,), jnp.float32)
    return p


def build_unet_generator(key, input_nc, output_nc, num_downs, ngf=64,
                         use_dropout=False):
    """Mirrors UnetGenerator.__init__ (norm_layer=BatchNorm2d)."""
    # TODO(synk): Dropout(0.5) not implemented (this config uses use_dropout=False)
    assert not use_dropout
    keys = jax.random.split(key, num_downs)
    i = 0
    blk = build_block(keys[i], ngf * 8, ngf * 8, innermost=True); i += 1
    for _ in range(num_downs - 5):
        blk = build_block(keys[i], ngf * 8, ngf * 8, submodule=blk); i += 1
    blk = build_block(keys[i], ngf * 4, ngf * 8, submodule=blk); i += 1
    blk = build_block(keys[i], ngf * 2, ngf * 4, submodule=blk); i += 1
    blk = build_block(keys[i], ngf, ngf * 2, submodule=blk); i += 1
    blk = build_block(keys[i], output_nc, ngf, input_nc=input_nc,
                      submodule=blk, outermost=True)
    return blk


# ------------------------- forward pass -------------------------

def _bn_scale_shift(psum, psq, count, gamma, beta, eps=1e-5):
    """Training-mode BatchNorm2d (batch stats, biased var) -> per-channel affine."""
    mean = psum / count
    var = jnp.maximum(psq / count - mean * mean, 0.0)
    s = gamma * jax.lax.rsqrt(var + eps)
    return s, beta - mean * s


def _concat_skip(a, b):
    """Channel-concat of two (raw, scale, shift) deferred-affine tensors."""
    ra, sa, ta = a
    rb, sb, tb = b
    ca, cb = ra.shape[-1], rb.shape[-1]
    sa = jnp.ones((ca,), jnp.float32) if sa is None else sa
    ta = jnp.zeros((ca,), jnp.float32) if ta is None else ta
    sb = jnp.ones((cb,), jnp.float32) if sb is None else sb
    tb = jnp.zeros((cb,), jnp.float32) if tb is None else tb
    return (jnp.concatenate([ra.astype(jnp.bfloat16), rb.astype(jnp.bfloat16)],
                            axis=-1),
            jnp.concatenate([sa, sb]),
            jnp.concatenate([ta, tb]))


def block_forward(p, x_t):
    """UnetSkipConnectionBlock.forward; x_t = (raw NHWC, scale, shift)."""
    if p["outermost"]:
        h = conv_down(x_t, "none", p["down_w"], p["down_b"], p["down_cout"],
                      with_stats=False)
        sub = block_forward(p["submodule"], (h, None, None))
        # uprelu (in prep) + upconv(+bias) + Tanh (fused epilogue)
        return conv_up(sub, p["up_w"], p["up_b"], p["up_cout"], out_act="tanh",
                       with_stats=False, out_dtype=jnp.float32)
    if p["innermost"]:
        h = conv_down(x_t, "leaky_relu", p["down_w"], p["down_b"],
                      p["down_cout"], with_stats=False)
        y, ps, pq, cnt = conv_up((h, None, None), p["up_w"], p["up_b"],
                                 p["up_cout"], out_act="none", with_stats=True)
        s, t = _bn_scale_shift(ps, pq, cnt, p["upnorm_g"], p["upnorm_b"])
        return _concat_skip(x_t, (y, s, t))
    # intermediate block
    h, psd, pqd, cntd = conv_down(x_t, "leaky_relu", p["down_w"], p["down_b"],
                                  p["down_cout"], with_stats=True)
    sd, td = _bn_scale_shift(psd, pqd, cntd, p["downnorm_g"], p["downnorm_b"])
    sub = block_forward(p["submodule"], (h, sd, td))
    y, psu, pqu, cntu = conv_up(sub, p["up_w"], p["up_b"], p["up_cout"],
                                out_act="none", with_stats=True)
    su, tu = _bn_scale_shift(psu, pqu, cntu, p["upnorm_g"], p["upnorm_b"])
    return _concat_skip(x_t, (y, su, tu))


def unet_forward(params, x_nchw):
    x = jnp.transpose(x_nchw, (0, 2, 3, 1))        # NCHW -> NHWC
    y = block_forward(params, (x, None, None))
    return jnp.transpose(y, (0, 3, 1, 2))          # NHWC -> NCHW


# ------------------------- main -------------------------

if __name__ == "__main__":
    key = jax.random.PRNGKey(0)
    pkey, xkey = jax.random.split(key)

    # UnetGenerator(input_nc=3, output_nc=3, num_downs=5, ngf=8, norm=BatchNorm2d)
    input_nc, output_nc, num_downs, ngf = 3, 3, 5, 8
    params = build_unet_generator(pkey, input_nc, output_nc, num_downs, ngf=ngf)

    # 32x32 spatial so 5 downsamplings reach 1x1 at the bottleneck.
    x = jax.random.normal(xkey, (2, input_nc, 32, 32), jnp.float32)  # NCHW

    fwd = jax.jit(lambda inp: unet_forward(params, inp))
    y = fwd(x)
    y = jax.block_until_ready(y)
    assert y.shape == (2, output_nc, 32, 32), y.shape
    assert bool(jnp.all(jnp.isfinite(y)))
    print("KERNEL_OK")
</pallas_src>

<mosaic_0001>
module attributes {stable_mosaic.version = 11 : i64} {
  func.func @_gemm_kernel(%arg0: i32, %arg1: i32, %arg2: i32, %arg3: i32, %arg4: memref<1x512x128xbf16, #tpu.memory_space<vmem>>, %arg5: memref<1x128x128xbf16, #tpu.memory_space<vmem>>, %arg6: memref<1x128xf32, #tpu.memory_space<vmem>>, %arg7: memref<1x512x128xbf16, #tpu.memory_space<vmem>>, %arg8: memref<512x128xf32, #tpu.memory_space<vmem>>) attributes {dimension_semantics = [#tpu.dimension_semantics<parallel>, #tpu.dimension_semantics<parallel>, #tpu.dimension_semantics<parallel>, #tpu.dimension_semantics<arbitrary>], iteration_bounds = array<i64: 1, 1, 1, 1>, scalar_prefetch = 0 : i64, scratch_operands = 1 : i64, tpu.core_type = #tpu.core_type<tc>, window_params = [{transform_indices = @transform_0, window_bounds = array<i64: 1, 512, 128>}, {transform_indices = @transform_1, window_bounds = array<i64: 1, 128, 128>}, {transform_indices = @transform_2, window_bounds = array<i64: 1, 128>}, {transform_indices = @transform_3, window_bounds = array<i64: 1, 512, 128>}]} {
    %c0_i32 = arith.constant 0 : i32
    %0 = arith.cmpi eq, %arg3, %c0_i32 : i32
    %1 = arith.extui %0 : i1 to i32
    %c0_i32_0 = arith.constant 0 : i32
    %2 = arith.cmpi ne, %1, %c0_i32_0 : i32
    scf.if %2 {
      %cst_12 = arith.constant 0.000000e+00 : f32
      %14 = vector.broadcast %cst_12 : f32 to vector<512x128xf32>
      %c0_13 = arith.constant 0 : index
      %c0_14 = arith.constant 0 : index
      %15 = vector.load %arg8[%c0_13, %c0_14] : memref<512x128xf32, #tpu.memory_space<vmem>>, vector<512x128xf32>
      tpu.vector_store %arg8[%c0_13, %c0_14], %14 {strides = array<i32>} : memref<512x128xf32, #tpu.memory_space<vmem>>, vector<512x128xf32>,
    } else {
    }
    %c0 = arith.constant 0 : index
    %c0_1 = arith.constant 0 : index
    %3 = vector.load %arg8[%c0, %c0_1] : memref<512x128xf32, #tpu.memory_space<vmem>>, vector<512x128xf32>
    %c0_2 = arith.constant 0 : index
    %c0_3 = arith.constant 0 : index
    %c0_4 = arith.constant 0 : index
    %4 = vector.load %arg4[%c0_2, %c0_3, %c0_4] : memref<1x512x128xbf16, #tpu.memory_space<vmem>>, vector<1x512x128xbf16>
    %5 = vector.shape_cast %4 : vector<1x512x128xbf16> to vector<512x128xbf16>
    %c0_5 = arith.constant 0 : index
    %c0_6 = arith.constant 0 : index
    %c0_7 = arith.constant 0 : index
    %6 = vector.load %arg5[%c0_5, %c0_6, %c0_7] : memref<1x128x128xbf16, #tpu.memory_space<vmem>>, vector<1x128x128xbf16>
    %7 = vector.shape_cast %6 : vector<1x128x128xbf16> to vector<128x128xbf16>
    %cst = arith.constant dense<0.000000e+00> : vector<512x128xf32>
    %8 = tpu.matmul %5, %7, %cst {dimension_numbers = #tpu.dot_dimension_numbers<[1], [0], [0], [1], [0, 0, 1, 1], [], []>} : vector<512x128xbf16>, vector<128x128xbf16>, vector<512x128xf32> -> vector<512x128xf32>
    %9 = arith.addf %3, %8 : vector<512x128xf32>
    %c0_8 = arith.constant 0 : index
    %c0_9 = arith.constant 0 : index
    %10 = vector.load %arg8[%c0_8, %c0_9] : memref<512x128xf32, #tpu.memory_space<vmem>>, vector<512x128xf32>
    tpu.vector_store %arg8[%c0_8, %c0_9], %9 {strides = array<i32>} : memref<512x128xf32, #tpu.memory_space<vmem>>, vector<512x128xf32>,
    %c0_i32_10 = arith.constant 0 : i32
    %11 = arith.cmpi eq, %arg3, %c0_i32_10 : i32
    %12 = arith.extui %11 : i1 to i32
    %c0_i32_11 = arith.constant 0 : i32
    %13 = arith.cmpi ne, %12, %c0_i32_11 : i32
    scf.if %13 {
      %c0_12 = arith.constant 0 : index
      %c0_13 = arith.constant 0 : index
      %14 = vector.load %arg8[%c0_12, %c0_13] : memref<512x128xf32, #tpu.memory_space<vmem>>, vector<512x128xf32>
      %c0_14 = arith.constant 0 : index
      %c0_15 = arith.constant 0 : index
      %15 = vector.load %arg6[%c0_14, %c0_15] : memref<1x128xf32, #tpu.memory_space<vmem>>, vector<1x128xf32>
      %16 = vector.broadcast %15 : vector<1x128xf32> to vector<512x128xf32>
      %17 = arith.addf %14, %16 : vector<512x128xf32>
      %18 = arith.truncf %17 : vector<512x128xf32> to vector<512x128xbf16>
      %c0_16 = arith.constant 0 : index
      %c0_17 = arith.constant 0 : index
      %c0_18 = arith.constant 0 : index
      %19 = vector.load %arg7[%c0_16, %c0_17, %c0_18] : memref<1x512x128xbf16, #tpu.memory_space<vmem>>, vector<1x512x128xbf16>
      %20 = vector.shape_cast %19 : vector<1x512x128xbf16> to vector<512x128xbf16>
      %21 = vector.shape_cast %18 : vector<512x128xbf16> to vector<1x512x128xbf16>
      tpu.vector_store %arg7[%c0_16, %c0_17, %c0_18], %21 {strides = array<i32>} : memref<1x512x128xbf16, #tpu.memory_space<vmem>>, vector<1x512x128xbf16>,
    } else {
    }
    return
  }
  func.func @transform_0(%arg0: i32, %arg1: i32, %arg2: i32, %arg3: i32) -> (i32, i32, i32) {
    %c0_i32 = arith.constant 0 : i32
    return %arg0, %arg1, %arg3 : i32, i32, i32
  }
  func.func @transform_1(%arg0: i32, %arg1: i32, %arg2: i32, %arg3: i32) -> (i32, i32, i32) {
    %c0_i32 = arith.constant 0 : i32
    return %arg0, %arg3, %arg2 : i32, i32, i32
  }
  func.func @transform_2(%arg0: i32, %arg1: i32, %arg2: i32, %arg3: i32) -> (i32, i32) {
    %c0_i32 = arith.constant 0 : i32
    %c0_i32_0 = arith.constant 0 : i32
    return %c0_i32, %arg2 : i32, i32
  }
  func.func @transform_3(%arg0: i32, %arg1: i32, %arg2: i32, %arg3: i32) -> (i32, i32, i32) {
    %c0_i32 = arith.constant 0 : i32
    return %arg0, %arg1, %arg2 : i32, i32, i32
  }
}

module attributes {stable_mosaic.version = 11 : i64} {
  func.func @_gemm_kernel(%arg0: i32, %arg1: i32, %arg2: i32, %arg3: i32, %arg4: memref<1x128x128xbf16, #tpu.memory_space<vmem>>, %arg5: memref<1x128x128xbf16, #tpu.memory_space<vmem>>, %arg6: memref<1x128xf32, #tpu.memory_space<vmem>>, %arg7: memref<1x128x128xbf16, #tpu.memory_space<vmem>>, %arg8: memref<1x8x128xf32, #tpu.memory_space<vmem>>, %arg9: memref<128x128xf32, #tpu.memory_space<vmem>>) attributes {dimension_semantics = [#tpu.dimension_semantics<parallel>, #tpu.dimension_semantics<parallel>, #tpu.dimension_semantics<parallel>, #tpu.dimension_semantics<arbitrary>], iteration_bounds = array<i64: 1, 1, 1, 1>, scalar_prefetch = 0 : i64, scratch_operands = 1 : i64, tpu.core_type = #tpu.core_type<tc>, window_params = [{transform_indices = @transform_0, window_bounds = array<i64: 1, 128, 128>}, {transform_indices = @transform_1, window_bounds = array<i64: 1, 128, 128>}, {transform_indices = @transform_2, window_bounds = array<i64: 1, 128>}, {transform_indices = @transform_3, window_bounds = array<i64: 1, 128, 128>}, {transform_indices = @transform_4, window_bounds = array<i64: 1, 8, 128>}]} {
    %c0_i32 = arith.constant 0 : i32
    %0 = arith.cmpi eq, %arg3, %c0_i32 : i32
    %1 = arith.extui %0 : i1 to i32
    %c0_i32_0 = arith.constant 0 : i32
    %2 = arith.cmpi ne, %1, %c0_i32_0 : i32
    scf.if %2 {
      %cst_12 = arith.constant 0.000000e+00 : f32
      %14 = vector.broadcast %cst_12 : f32 to vector<128x128xf32>
      %c0_13 = arith.constant 0 : index
      %c0_14 = arith.constant 0 : index
      %15 = vector.load %arg9[%c0_13, %c0_14] : memref<128x128xf32, #tpu.memory_space<vmem>>, vector<128x128xf32>
      tpu.vector_store %arg9[%c0_13, %c0_14], %14 {strides = array<i32>} : memref<128x128xf32, #tpu.memory_space<vmem>>, vector<128x128xf32>,
    } else {
    }
    %c0 = arith.constant 0 : index
    %c0_1 = arith.constant 0 : index
    %3 = vector.load %arg9[%c0, %c0_1] : memref<128x128xf32, #tpu.memory_space<vmem>>, vector<128x128xf32>
    %c0_2 = arith.constant 0 : index
    %c0_3 = arith.constant 0 : index
    %c0_4 = arith.constant 0 : index
    %4 = vector.load %arg4[%c0_2, %c0_3, %c0_4] : memref<1x128x128xbf16, #tpu.memory_space<vmem>>, vector<1x128x128xbf16>
    %5 = vector.shape_cast %4 : vector<1x128x128xbf16> to vector<128x128xbf16>
    %c0_5 = arith.constant 0 : index
    %c0_6 = arith.constant 0 : index
    %c0_7 = arith.constant 0 : index
    %6 = vector.load %arg5[%c0_5, %c0_6, %c0_7] : memref<1x128x128xbf16, #tpu.memory_space<vmem>>, vector<1x128x128xbf16>
    %7 = vector.shape_cast %6 : vector<1x128x128xbf16> to vector<128x128xbf16>
    %cst = arith.constant dense<0.000000e+00> : vector<128x128xf32>
    %8 = tpu.matmul %5, %7, %cst {dimension_numbers = #tpu.dot_dimension_numbers<[1], [0], [0], [1], [0, 0, 1, 1], [], []>} : vector<128x128xbf16>, vector<128x128xbf16>, vector<128x128xf32> -> vector<128x128xf32>
    %9 = arith.addf %3, %8 : vector<128x128xf32>
    %c0_8 = arith.constant 0 : index
    %c0_9 = arith.constant 0 : index
    %10 = vector.load %arg9[%c0_8, %c0_9] : memref<128x128xf32, #tpu.memory_space<vmem>>, vector<128x128xf32>
    tpu.vector_store %arg9[%c0_8, %c0_9], %9 {strides = array<i32>} : memref<128x128xf32, #tpu.memory_space<vmem>>, vector<128x128xf32>,
    %c0_i32_10 = arith.constant 0 : i32
    %11 = arith.cmpi eq, %arg3, %c0_i32_10 : i32
    %12 = arith.extui %11 : i1 to i32
    %c0_i32_11 = arith.constant 0 : i32
    %13 = arith.cmpi ne, %12, %c0_i32_11 : i32
    scf.if %13 {
      %c0_12 = arith.constant 0 : index
      %c0_13 = arith.constant 0 : index
      %14 = vector.load %arg9[%c0_12, %c0_13] : memref<128x128xf32, #tpu.memory_space<vmem>>, vector<128x128xf32>
      %c0_14 = arith.constant 0 : index
      %c0_15 = arith.constant 0 : index
      %15 = vector.load %arg6[%c0_14, %c0_15] : memref<1x128xf32, #tpu.memory_space<vmem>>, vector<1x128xf32>
      %16 = vector.broadcast %15 : vector<1x128xf32> to vector<128x128xf32>
      %17 = arith.addf %14, %16 : vector<128x128xf32>
      %18 = arith.truncf %17 : vector<128x128xf32> to vector<128x128xbf16>
      %c0_16 = arith.constant 0 : index
      %c0_17 = arith.constant 0 : index
      %c0_18 = arith.constant 0 : index
      %19 = vector.load %arg7[%c0_16, %c0_17, %c0_18] : memref<1x128x128xbf16, #tpu.memory_space<vmem>>, vector<1x128x128xbf16>
      %20 = vector.shape_cast %19 : vector<1x128x128xbf16> to vector<128x128xbf16>
      %21 = vector.shape_cast %18 : vector<128x128xbf16> to vector<1x128x128xbf16>
      tpu.vector_store %arg7[%c0_16, %c0_17, %c0_18], %21 {strides = array<i32>} : memref<1x128x128xbf16, #tpu.memory_space<vmem>>, vector<1x128x128xbf16>,
      %cst_19 = arith.constant dense<0.000000e+00> : vector<128xf32>
      %22 = vector.multi_reduction <add>, %14, %cst_19 [0] : vector<128x128xf32> to vector<128xf32>
      %23 = vector.shape_cast %22 : vector<128xf32> to vector<1x128xf32>
      %24 = arith.mulf %14, %14 : vector<128x128xf32>
      %cst_20 = arith.constant dense<0.000000e+00> : vector<128xf32>
      %25 = vector.multi_reduction <add>, %24, %cst_20 [0] : vector<128x128xf32> to vector<128xf32>
      %26 = vector.shape_cast %25 : vector<128xf32> to vector<1x128xf32>
      %27 = tpu.concatenate %23, %26 in 0 : vector<1x128xf32>, vector<1x128xf32> -> vector<2x128xf32>
      %c0_21 = arith.constant 0 : index
      %c0_22 = arith.constant 0 : index
      %c0_23 = arith.constant 0 : index
      %28 = vector.load %arg8[%c0_21, %c0_22, %c0_23] : memref<1x8x128xf32, #tpu.memory_space<vmem>>, vector<1x2x128xf32>
      %29 = vector.shape_cast %28 : vector<1x2x128xf32> to vector<2x128xf32>
      %30 = vector.shape_cast %27 : vector<2x128xf32> to vector<1x2x128xf32>
      tpu.vector_store %arg8[%c0_21, %c0_22, %c0_23], %30 {strides = array<i32>} : memref<1x8x128xf32, #tpu.memory_space<vmem>>, vector<1x2x128xf32>,
    } else {
    }
    return
  }
  func.func @transform_0(%arg0: i32, %arg1: i32, %arg2: i32, %arg3: i32) -> (i32, i32, i32) {
    %c0_i32 = arith.constant 0 : i32
    return %arg0, %arg1, %arg3 : i32, i32, i32
  }
  func.func @transform_1(%arg0: i32, %arg1: i32, %arg2: i32, %arg3: i32) -> (i32, i32, i32) {
    %c0_i32 = arith.constant 0 : i32
    return %arg0, %arg3, %arg2 : i32, i32, i32
  }
  func.func @transform_2(%arg0: i32, %arg1: i32, %arg2: i32, %arg3: i32) -> (i32, i32) {
    %c0_i32 = arith.constant 0 : i32
    %c0_i32_0 = arith.constant 0 : i32
    return %c0_i32, %arg2 : i32, i32
  }
  func.func @transform_3(%arg0: i32, %arg1: i32, %arg2: i32, %arg3: i32) -> (i32, i32, i32) {
    %c0_i32 = arith.constant 0 : i32
    return %arg0, %arg1, %arg2 : i32, i32, i32
  }
  func.func @transform_4(%arg0: i32, %arg1: i32, %arg2: i32, %arg3: i32) -> (i32, i32, i32) {
    %c0_i32 = arith.constant 0 : i32
    return %arg0, %arg1, %arg2 : i32, i32, i32
  }
}

module attributes {stable_mosaic.version = 11 : i64} {
  func.func @_gemm_kernel(%arg0: i32, %arg1: i32, %arg2: i32, %arg3: i32, %arg4: memref<1x32x256xbf16, #tpu.memory_space<vmem>>, %arg5: memref<1x256x128xbf16, #tpu.memory_space<vmem>>, %arg6: memref<1x128xf32, #tpu.memory_space<vmem>>, %arg7: memref<1x32x128xbf16, #tpu.memory_space<vmem>>, %arg8: memref<1x8x128xf32, #tpu.memory_space<vmem>>, %arg9: memref<32x128xf32, #tpu.memory_space<vmem>>) attributes {dimension_semantics = [#tpu.dimension_semantics<parallel>, #tpu.dimension_semantics<parallel>, #tpu.dimension_semantics<parallel>, #tpu.dimension_semantics<arbitrary>], iteration_bounds = array<i64: 1, 1, 1, 1>, scalar_prefetch = 0 : i64, scratch_operands = 1 : i64, tpu.core_type = #tpu.core_type<tc>, window_params = [{transform_indices = @transform_0, window_bounds = array<i64: 1, 32, 256>}, {transform_indices = @transform_1, window_bounds = array<i64: 1, 256, 128>}, {transform_indices = @transform_2, window_bounds = array<i64: 1, 128>}, {transform_indices = @transform_3, window_bounds = array<i64: 1, 32, 128>}, {transform_indices = @transform_4, window_bounds = array<i64: 1, 8, 128>}]} {
    %c0_i32 = arith.constant 0 : i32
    %0 = arith.cmpi eq, %arg3, %c0_i32 : i32
    %1 = arith.extui %0 : i1 to i32
    %c0_i32_0 = arith.constant 0 : i32
    %2 = arith.cmpi ne, %1, %c0_i32_0 : i32
    scf.if %2 {
      %cst_12 = arith.constant 0.000000e+00 : f32
      %14 = vector.broadcast %cst_12 : f32 to vector<32x128xf32>
      %c0_13 = arith.constant 0 : index
      %c0_14 = arith.constant 0 : index
      %15 = vector.load %arg9[%c0_13, %c0_14] : memref<32x128xf32, #tpu.memory_space<vmem>>, vector<32x128xf32>
      tpu.vector_store %arg9[%c0_13, %c0_14], %14 {strides = array<i32>} : memref<32x128xf32, #tpu.memory_space<vmem>>, vector<32x128xf32>,
    } else {
    }
    %c0 = arith.constant 0 : index
    %c0_1 = arith.constant 0 : index
    %3 = vector.load %arg9[%c0, %c0_1] : memref<32x128xf32, #tpu.memory_space<vmem>>, vector<32x128xf32>
    %c0_2 = arith.constant 0 : index
    %c0_3 = arith.constant 0 : index
    %c0_4 = arith.constant 0 : index
    %4 = vector.load %arg4[%c0_2, %c0_3, %c0_4] : memref<1x32x256xbf16, #tpu.memory_space<vmem>>, vector<1x32x256xbf16>
    %5 = vector.shape_cast %4 : vector<1x32x256xbf16> to vector<32x256xbf16>
    %c0_5 = arith.constant 0 : index
    %c0_6 = arith.constant 0 : index
    %c0_7 = arith.constant 0 : index
    %6 = vector.load %arg5[%c0_5, %c0_6, %c0_7] : memref<1x256x128xbf16, #tpu.memory_space<vmem>>, vector<1x256x128xbf16>
    %7 = vector.shape_cast %6 : vector<1x256x128xbf16> to vector<256x128xbf16>
    %cst = arith.constant dense<0.000000e+00> : vector<32x128xf32>
    %8 = tpu.matmul %5, %7, %cst {dimension_numbers = #tpu.dot_dimension_numbers<[1], [0], [0], [1], [0, 0, 1, 1], [], []>} : vector<32x256xbf16>, vector<256x128xbf16>, vector<32x128xf32> -> vector<32x128xf32>
    %9 = arith.addf %3, %8 : vector<32x128xf32>
    %c0_8 = arith.constant 0 : index
    %c0_9 = arith.constant 0 : index
    %10 = vector.load %arg9[%c0_8, %c0_9] : memref<32x128xf32, #tpu.memory_space<vmem>>, vector<32x128xf32>
    tpu.vector_store %arg9[%c0_8, %c0_9], %9 {strides = array<i32>} : memref<32x128xf32, #tpu.memory_space<vmem>>, vector<32x128xf32>,
    %c0_i32_10 = arith.constant 0 : i32
    %11 = arith.cmpi eq, %arg3, %c0_i32_10 : i32
    %12 = arith.extui %11 : i1 to i32
    %c0_i32_11 = arith.constant 0 : i32
    %13 = arith.cmpi ne, %12, %c0_i32_11 : i32
    scf.if %13 {
      %c0_12 = arith.constant 0 : index
      %c0_13 = arith.constant 0 : index
      %14 = vector.load %arg9[%c0_12, %c0_13] : memref<32x128xf32, #tpu.memory_space<vmem>>, vector<32x128xf32>
      %c0_14 = arith.constant 0 : index
      %c0_15 = arith.constant 0 : index
      %15 = vector.load %arg6[%c0_14, %c0_15] : memref<1x128xf32, #tpu.memory_space<vmem>>, vector<1x128xf32>
      %16 = vector.broadcast %15 : vector<1x128xf32> to vector<32x128xf32>
      %17 = arith.addf %14, %16 : vector<32x128xf32>
      %18 = arith.truncf %17 : vector<32x128xf32> to vector<32x128xbf16>
      %c0_16 = arith.constant 0 : index
      %c0_17 = arith.constant 0 : index
      %c0_18 = arith.constant 0 : index
      %19 = vector.load %arg7[%c0_16, %c0_17, %c0_18] : memref<1x32x128xbf16, #tpu.memory_space<vmem>>, vector<1x32x128xbf16>
      %20 = vector.shape_cast %19 : vector<1x32x128xbf16> to vector<32x128xbf16>
      %21 = vector.shape_cast %18 : vector<32x128xbf16> to vector<1x32x128xbf16>
      tpu.vector_store %arg7[%c0_16, %c0_17, %c0_18], %21 {strides = array<i32>} : memref<1x32x128xbf16, #tpu.memory_space<vmem>>, vector<1x32x128xbf16>,
      %cst_19 = arith.constant dense<0.000000e+00> : vector<128xf32>
      %22 = vector.multi_reduction <add>, %14, %cst_19 [0] : vector<32x128xf32> to vector<128xf32>
      %23 = vector.shape_cast %22 : vector<128xf32> to vector<1x128xf32>
      %24 = arith.mulf %14, %14 : vector<32x128xf32>
      %cst_20 = arith.constant dense<0.000000e+00> : vector<128xf32>
      %25 = vector.multi_reduction <add>, %24, %cst_20 [0] : vector<32x128xf32> to vector<128xf32>
      %26 = vector.shape_cast %25 : vector<128xf32> to vector<1x128xf32>
      %27 = tpu.concatenate %23, %26 in 0 : vector<1x128xf32>, vector<1x128xf32> -> vector<2x128xf32>
      %c0_21 = arith.constant 0 : index
      %c0_22 = arith.constant 0 : index
      %c0_23 = arith.constant 0 : index
      %28 = vector.load %arg8[%c0_21, %c0_22, %c0_23] : memref<1x8x128xf32, #tpu.memory_space<vmem>>, vector<1x2x128xf32>
      %29 = vector.shape_cast %28 : vector<1x2x128xf32> to vector<2x128xf32>
      %30 = vector.shape_cast %27 : vector<2x128xf32> to vector<1x2x128xf32>
      tpu.vector_store %arg8[%c0_21, %c0_22, %c0_23], %30 {strides = array<i32>} : memref<1x8x128xf32, #tpu.memory_space<vmem>>, vector<1x2x128xf32>,
    } else {
    }
    return
  }
  func.func @transform_0(%arg0: i32, %arg1: i32, %arg2: i32, %arg3: i32) -> (i32, i32, i32) {
    %c0_i32 = arith.constant 0 : i32
    return %arg0, %arg1, %arg3 : i32, i32, i32
  }
  func.func @transform_1(%arg0: i32, %arg1: i32, %arg2: i32, %arg3: i32) -> (i32, i32, i32) {
    %c0_i32 = arith.constant 0 : i32
    return %arg0, %arg3, %arg2 : i32, i32, i32
  }
  func.func @transform_2(%arg0: i32, %arg1: i32, %arg2: i32, %arg3: i32) -> (i32, i32) {
    %c0_i32 = arith.constant 0 : i32
    %c0_i32_0 = arith.constant 0 : i32
    return %c0_i32, %arg2 : i32, i32
  }
  func.func @transform_3(%arg0: i32, %arg1: i32, %arg2: i32, %arg3: i32) -> (i32, i32, i32) {
    %c0_i32 = arith.constant 0 : i32
    return %arg0, %arg1, %arg2 : i32, i32, i32
  }
  func.func @transform_4(%arg0: i32, %arg1: i32, %arg2: i32, %arg3: i32) -> (i32, i32, i32) {
    %c0_i32 = arith.constant 0 : i32
    return %arg0, %arg1, %arg2 : i32, i32, i32
  }
}

module attributes {stable_mosaic.version = 11 : i64} {
  func.func @_gemm_kernel(%arg0: i32, %arg1: i32, %arg2: i32, %arg3: i32, %arg4: memref<1x32x256xbf16, #tpu.memory_space<vmem>>, %arg5: memref<1x256x128xbf16, #tpu.memory_space<vmem>>, %arg6: memref<1x128xf32, #tpu.memory_space<vmem>>, %arg7: memref<1x32x128xbf16, #tpu.memory_space<vmem>>, %arg8: memref<1x8x128xf32, #tpu.memory_space<vmem>>, %arg9: memref<32x128xf32, #tpu.memory_space<vmem>>) attributes {dimension_semantics = [#tpu.dimension_semantics<parallel>, #tpu.dimension_semantics<parallel>, #tpu.dimension_semantics<parallel>, #tpu.dimension_semantics<arbitrary>], iteration_bounds = array<i64: 4, 1, 1, 1>, scalar_prefetch = 0 : i64, scratch_operands = 1 : i64, tpu.core_type = #tpu.core_type<tc>, window_params = [{transform_indices = @transform_0, window_bounds = array<i64: 1, 32, 256>}, {transform_indices = @transform_1, window_bounds = array<i64: 1, 256, 128>}, {transform_indices = @transform_2, window_bounds = array<i64: 1, 128>}, {transform_indices = @transform_3, window_bounds = array<i64: 1, 32, 128>}, {transform_indices = @transform_4, window_bounds = array<i64: 1, 8, 128>}]} {
    %c0_i32 = arith.constant 0 : i32
    %0 = arith.cmpi eq, %arg3, %c0_i32 : i32
    %1 = arith.extui %0 : i1 to i32
    %c0_i32_0 = arith.constant 0 : i32
    %2 = arith.cmpi ne, %1, %c0_i32_0 : i32
    scf.if %2 {
      %cst_12 = arith.constant 0.000000e+00 : f32
      %14 = vector.broadcast %cst_12 : f32 to vector<32x128xf32>
      %c0_13 = arith.constant 0 : index
      %c0_14 = arith.constant 0 : index
      %15 = vector.load %arg9[%c0_13, %c0_14] : memref<32x128xf32, #tpu.memory_space<vmem>>, vector<32x128xf32>
      tpu.vector_store %arg9[%c0_13, %c0_14], %14 {strides = array<i32>} : memref<32x128xf32, #tpu.memory_space<vmem>>, vector<32x128xf32>,
    } else {
    }
    %c0 = arith.constant 0 : index
    %c0_1 = arith.constant 0 : index
    %3 = vector.load %arg9[%c0, %c0_1] : memref<32x128xf32, #tpu.memory_space<vmem>>, vector<32x128xf32>
    %c0_2 = arith.constant 0 : index
    %c0_3 = arith.constant 0 : index
    %c0_4 = arith.constant 0 : index
    %4 = vector.load %arg4[%c0_2, %c0_3, %c0_4] : memref<1x32x256xbf16, #tpu.memory_space<vmem>>, vector<1x32x256xbf16>
    %5 = vector.shape_cast %4 : vector<1x32x256xbf16> to vector<32x256xbf16>
    %c0_5 = arith.constant 0 : index
    %c0_6 = arith.constant 0 : index
    %c0_7 = arith.constant 0 : index
    %6 = vector.load %arg5[%c0_5, %c0_6, %c0_7] : memref<1x256x128xbf16, #tpu.memory_space<vmem>>, vector<1x256x128xbf16>
    %7 = vector.shape_cast %6 : vector<1x256x128xbf16> to vector<256x128xbf16>
    %cst = arith.constant dense<0.000000e+00> : vector<32x128xf32>
    %8 = tpu.matmul %5, %7, %cst {dimension_numbers = #tpu.dot_dimension_numbers<[1], [0], [0], [1], [0, 0, 1, 1], [], []>} : vector<32x256xbf16>, vector<256x128xbf16>, vector<32x128xf32> -> vector<32x128xf32>
    %9 = arith.addf %3, %8 : vector<32x128xf32>
    %c0_8 = arith.constant 0 : index
    %c0_9 = arith.constant 0 : index
    %10 = vector.load %arg9[%c0_8, %c0_9] : memref<32x128xf32, #tpu.memory_space<vmem>>, vector<32x128xf32>
    tpu.vector_store %arg9[%c0_8, %c0_9], %9 {strides = array<i32>} : memref<32x128xf32, #tpu.memory_space<vmem>>, vector<32x128xf32>,
    %c0_i32_10 = arith.constant 0 : i32
    %11 = arith.cmpi eq, %arg3, %c0_i32_10 : i32
    %12 = arith.extui %11 : i1 to i32
    %c0_i32_11 = arith.constant 0 : i32
    %13 = arith.cmpi ne, %12, %c0_i32_11 : i32
    scf.if %13 {
      %c0_12 = arith.constant 0 : index
      %c0_13 = arith.constant 0 : index
      %14 = vector.load %arg9[%c0_12, %c0_13] : memref<32x128xf32, #tpu.memory_space<vmem>>, vector<32x128xf32>
      %c0_14 = arith.constant 0 : index
      %c0_15 = arith.constant 0 : index
      %15 = vector.load %arg6[%c0_14, %c0_15] : memref<1x128xf32, #tpu.memory_space<vmem>>, vector<1x128xf32>
      %16 = vector.broadcast %15 : vector<1x128xf32> to vector<32x128xf32>
      %17 = arith.addf %14, %16 : vector<32x128xf32>
      %18 = arith.truncf %17 : vector<32x128xf32> to vector<32x128xbf16>
      %c0_16 = arith.constant 0 : index
      %c0_17 = arith.constant 0 : index
      %c0_18 = arith.constant 0 : index
      %19 = vector.load %arg7[%c0_16, %c0_17, %c0_18] : memref<1x32x128xbf16, #tpu.memory_space<vmem>>, vector<1x32x128xbf16>
      %20 = vector.shape_cast %19 : vector<1x32x128xbf16> to vector<32x128xbf16>
      %21 = vector.shape_cast %18 : vector<32x128xbf16> to vector<1x32x128xbf16>
      tpu.vector_store %arg7[%c0_16, %c0_17, %c0_18], %21 {strides = array<i32>} : memref<1x32x128xbf16, #tpu.memory_space<vmem>>, vector<1x32x128xbf16>,
      %cst_19 = arith.constant dense<0.000000e+00> : vector<128xf32>
      %22 = vector.multi_reduction <add>, %14, %cst_19 [0] : vector<32x128xf32> to vector<128xf32>
      %23 = vector.shape_cast %22 : vector<128xf32> to vector<1x128xf32>
      %24 = arith.mulf %14, %14 : vector<32x128xf32>
      %cst_20 = arith.constant dense<0.000000e+00> : vector<128xf32>
      %25 = vector.multi_reduction <add>, %24, %cst_20 [0] : vector<32x128xf32> to vector<128xf32>
      %26 = vector.shape_cast %25 : vector<128xf32> to vector<1x128xf32>
      %27 = tpu.concatenate %23, %26 in 0 : vector<1x128xf32>, vector<1x128xf32> -> vector<2x128xf32>
      %c0_21 = arith.constant 0 : index
      %c0_22 = arith.constant 0 : index
      %c0_23 = arith.constant 0 : index
      %28 = vector.load %arg8[%c0_21, %c0_22, %c0_23] : memref<1x8x128xf32, #tpu.memory_space<vmem>>, vector<1x2x128xf32>
      %29 = vector.shape_cast %28 : vector<1x2x128xf32> to vector<2x128xf32>
      %30 = vector.shape_cast %27 : vector<2x128xf32> to vector<1x2x128xf32>
      tpu.vector_store %arg8[%c0_21, %c0_22, %c0_23], %30 {strides = array<i32>} : memref<1x8x128xf32, #tpu.memory_space<vmem>>, vector<1x2x128xf32>,
    } else {
    }
    return
  }
  func.func @transform_0(%arg0: i32, %arg1: i32, %arg2: i32, %arg3: i32) -> (i32, i32, i32) {
    %c0_i32 = arith.constant 0 : i32
    return %arg0, %arg1, %arg3 : i32, i32, i32
  }
  func.func @transform_1(%arg0: i32, %arg1: i32, %arg2: i32, %arg3: i32) -> (i32, i32, i32) {
    %c0_i32 = arith.constant 0 : i32
    return %arg0, %arg3, %arg2 : i32, i32, i32
  }
  func.func @transform_2(%arg0: i32, %arg1: i32, %arg2: i32, %arg3: i32) -> (i32, i32) {
    %c0_i32 = arith.constant 0 : i32
    %c0_i32_0 = arith.constant 0 : i32
    return %c0_i32, %arg2 : i32, i32
  }
  func.func @transform_3(%arg0: i32, %arg1: i32, %arg2: i32, %arg3: i32) -> (i32, i32, i32) {
    %c0_i32 = arith.constant 0 : i32
    return %arg0, %arg1, %arg2 : i32, i32, i32
  }
  func.func @transform_4(%arg0: i32, %arg1: i32, %arg2: i32, %arg3: i32) -> (i32, i32, i32) {
    %c0_i32 = arith.constant 0 : i32
    return %arg0, %arg1, %arg2 : i32, i32, i32
  }
}

module attributes {stable_mosaic.version = 11 : i64} {
  func.func @_gemm_kernel(%arg0: i32, %arg1: i32, %arg2: i32, %arg3: i32, %arg4: memref<1x128x128xbf16, #tpu.memory_space<vmem>>, %arg5: memref<1x128x128xbf16, #tpu.memory_space<vmem>>, %arg6: memref<1x128xf32, #tpu.memory_space<vmem>>, %arg7: memref<1x128x128xbf16, #tpu.memory_space<vmem>>, %arg8: memref<1x8x128xf32, #tpu.memory_space<vmem>>, %arg9: memref<128x128xf32, #tpu.memory_space<vmem>>) attributes {dimension_semantics = [#tpu.dimension_semantics<parallel>, #tpu.dimension_semantics<parallel>, #tpu.dimension_semantics<parallel>, #tpu.dimension_semantics<arbitrary>], iteration_bounds = array<i64: 4, 1, 1, 1>, scalar_prefetch = 0 : i64, scratch_operands = 1 : i64, tpu.core_type = #tpu.core_type<tc>, window_params = [{transform_indices = @transform_0, window_bounds = array<i64: 1, 128, 128>}, {transform_indices = @transform_1, window_bounds = array<i64: 1, 128, 128>}, {transform_indices = @transform_2, window_bounds = array<i64: 1, 128>}, {transform_indices = @transform_3, window_bounds = array<i64: 1, 128, 128>}, {transform_indices = @transform_4, window_bounds = array<i64: 1, 8, 128>}]} {
    %c0_i32 = arith.constant 0 : i32
    %0 = arith.cmpi eq, %arg3, %c0_i32 : i32
    %1 = arith.extui %0 : i1 to i32
    %c0_i32_0 = arith.constant 0 : i32
    %2 = arith.cmpi ne, %1, %c0_i32_0 : i32
    scf.if %2 {
      %cst_12 = arith.constant 0.000000e+00 : f32
      %14 = vector.broadcast %cst_12 : f32 to vector<128x128xf32>
      %c0_13 = arith.constant 0 : index
      %c0_14 = arith.constant 0 : index
      %15 = vector.load %arg9[%c0_13, %c0_14] : memref<128x128xf32, #tpu.memory_space<vmem>>, vector<128x128xf32>
      tpu.vector_store %arg9[%c0_13, %c0_14], %14 {strides = array<i32>} : memref<128x128xf32, #tpu.memory_space<vmem>>, vector<128x128xf32>,
    } else {
    }
    %c0 = arith.constant 0 : index
    %c0_1 = arith.constant 0 : index
    %3 = vector.load %arg9[%c0, %c0_1] : memref<128x128xf32, #tpu.memory_space<vmem>>, vector<128x128xf32>
    %c0_2 = arith.constant 0 : index
    %c0_3 = arith.constant 0 : index
    %c0_4 = arith.constant 0 : index
    %4 = vector.load %arg4[%c0_2, %c0_3, %c0_4] : memref<1x128x128xbf16, #tpu.memory_space<vmem>>, vector<1x128x128xbf16>
    %5 = vector.shape_cast %4 : vector<1x128x128xbf16> to vector<128x128xbf16>
    %c0_5 = arith.constant 0 : index
    %c0_6 = arith.constant 0 : index
    %c0_7 = arith.constant 0 : index
    %6 = vector.load %arg5[%c0_5, %c0_6, %c0_7] : memref<1x128x128xbf16, #tpu.memory_space<vmem>>, vector<1x128x128xbf16>
    %7 = vector.shape_cast %6 : vector<1x128x128xbf16> to vector<128x128xbf16>
    %cst = arith.constant dense<0.000000e+00> : vector<128x128xf32>
    %8 = tpu.matmul %5, %7, %cst {dimension_numbers = #tpu.dot_dimension_numbers<[1], [0], [0], [1], [0, 0, 1, 1], [], []>} : vector<128x128xbf16>, vector<128x128xbf16>, vector<128x128xf32> -> vector<128x128xf32>
    %9 = arith.addf %3, %8 : vector<128x128xf32>
    %c0_8 = arith.constant 0 : index
    %c0_9 = arith.constant 0 : index
    %10 = vector.load %arg9[%c0_8, %c0_9] : memref<128x128xf32, #tpu.memory_space<vmem>>, vector<128x128xf32>
    tpu.vector_store %arg9[%c0_8, %c0_9], %9 {strides = array<i32>} : memref<128x128xf32, #tpu.memory_space<vmem>>, vector<128x128xf32>,
    %c0_i32_10 = arith.constant 0 : i32
    %11 = arith.cmpi eq, %arg3, %c0_i32_10 : i32
    %12 = arith.extui %11 : i1 to i32
    %c0_i32_11 = arith.constant 0 : i32
    %13 = arith.cmpi ne, %12, %c0_i32_11 : i32
    scf.if %13 {
      %c0_12 = arith.constant 0 : index
      %c0_13 = arith.constant 0 : index
      %14 = vector.load %arg9[%c0_12, %c0_13] : memref<128x128xf32, #tpu.memory_space<vmem>>, vector<128x128xf32>
      %c0_14 = arith.constant 0 : index
      %c0_15 = arith.constant 0 : index
      %15 = vector.load %arg6[%c0_14, %c0_15] : memref<1x128xf32, #tpu.memory_space<vmem>>, vector<1x128xf32>
      %16 = vector.broadcast %15 : vector<1x128xf32> to vector<128x128xf32>
      %17 = arith.addf %14, %16 : vector<128x128xf32>
      %18 = arith.truncf %17 : vector<128x128xf32> to vector<128x128xbf16>
      %c0_16 = arith.constant 0 : index
      %c0_17 = arith.constant 0 : index
      %c0_18 = arith.constant 0 : index
      %19 = vector.load %arg7[%c0_16, %c0_17, %c0_18] : memref<1x128x128xbf16, #tpu.memory_space<vmem>>, vector<1x128x128xbf16>
      %20 = vector.shape_cast %19 : vector<1x128x128xbf16> to vector<128x128xbf16>
      %21 = vector.shape_cast %18 : vector<128x128xbf16> to vector<1x128x128xbf16>
      tpu.vector_store %arg7[%c0_16, %c0_17, %c0_18], %21 {strides = array<i32>} : memref<1x128x128xbf16, #tpu.memory_space<vmem>>, vector<1x128x128xbf16>,
      %cst_19 = arith.constant dense<0.000000e+00> : vector<128xf32>
      %22 = vector.multi_reduction <add>, %14, %cst_19 [0] : vector<128x128xf32> to vector<128xf32>
      %23 = vector.shape_cast %22 : vector<128xf32> to vector<1x128xf32>
      %24 = arith.mulf %14, %14 : vector<128x128xf32>
      %cst_20 = arith.constant dense<0.000000e+00> : vector<128xf32>
      %25 = vector.multi_reduction <add>, %24, %cst_20 [0] : vector<128x128xf32> to vector<128xf32>
      %26 = vector.shape_cast %25 : vector<128xf32> to vector<1x128xf32>
      %27 = tpu.concatenate %23, %26 in 0 : vector<1x128xf32>, vector<1x128xf32> -> vector<2x128xf32>
      %c0_21 = arith.constant 0 : index
      %c0_22 = arith.constant 0 : index
      %c0_23 = arith.constant 0 : index
      %28 = vector.load %arg8[%c0_21, %c0_22, %c0_23] : memref<1x8x128xf32, #tpu.memory_space<vmem>>, vector<1x2x128xf32>
      %29 = vector.shape_cast %28 : vector<1x2x128xf32> to vector<2x128xf32>
      %30 = vector.shape_cast %27 : vector<2x128xf32> to vector<1x2x128xf32>
      tpu.vector_store %arg8[%c0_21, %c0_22, %c0_23], %30 {strides = array<i32>} : memref<1x8x128xf32, #tpu.memory_space<vmem>>, vector<1x2x128xf32>,
    } else {
    }
    return
  }
  func.func @transform_0(%arg0: i32, %arg1: i32, %arg2: i32, %arg3: i32) -> (i32, i32, i32) {
    %c0_i32 = arith.constant 0 : i32
    return %arg0, %arg1, %arg3 : i32, i32, i32
  }
  func.func @transform_1(%arg0: i32, %arg1: i32, %arg2: i32, %arg3: i32) -> (i32, i32, i32) {
    %c0_i32 = arith.constant 0 : i32
    return %arg0, %arg3, %arg2 : i32, i32, i32
  }
  func.func @transform_2(%arg0: i32, %arg1: i32, %arg2: i32, %arg3: i32) -> (i32, i32) {
    %c0_i32 = arith.constant 0 : i32
    %c0_i32_0 = arith.constant 0 : i32
    return %c0_i32, %arg2 : i32, i32
  }
  func.func @transform_3(%arg0: i32, %arg1: i32, %arg2: i32, %arg3: i32) -> (i32, i32, i32) {
    %c0_i32 = arith.constant 0 : i32
    return %arg0, %arg1, %arg2 : i32, i32, i32
  }
  func.func @transform_4(%arg0: i32, %arg1: i32, %arg2: i32, %arg3: i32) -> (i32, i32, i32) {
    %c0_i32 = arith.constant 0 : i32
    return %arg0, %arg1, %arg2 : i32, i32, i32
  }
}

module attributes {stable_mosaic.version = 11 : i64} {
  func.func @_gemm_kernel(%arg0: i32, %arg1: i32, %arg2: i32, %arg3: i32, %arg4: memref<1x512x128xbf16, #tpu.memory_space<vmem>>, %arg5: memref<1x128x128xbf16, #tpu.memory_space<vmem>>, %arg6: memref<1x128xf32, #tpu.memory_space<vmem>>, %arg7: memref<1x512x128xf32, #tpu.memory_space<vmem>>, %arg8: memref<512x128xf32, #tpu.memory_space<vmem>>) attributes {dimension_semantics = [#tpu.dimension_semantics<parallel>, #tpu.dimension_semantics<parallel>, #tpu.dimension_semantics<parallel>, #tpu.dimension_semantics<arbitrary>], iteration_bounds = array<i64: 4, 1, 1, 1>, scalar_prefetch = 0 : i64, scratch_operands = 1 : i64, tpu.core_type = #tpu.core_type<tc>, window_params = [{transform_indices = @transform_0, window_bounds = array<i64: 1, 512, 128>}, {transform_indices = @transform_1, window_bounds = array<i64: 1, 128, 128>}, {transform_indices = @transform_2, window_bounds = array<i64: 1, 128>}, {transform_indices = @transform_3, window_bounds = array<i64: 1, 512, 128>}]} {
    %c0_i32 = arith.constant 0 : i32
    %0 = arith.cmpi eq, %arg3, %c0_i32 : i32
    %1 = arith.extui %0 : i1 to i32
    %c0_i32_0 = arith.constant 0 : i32
    %2 = arith.cmpi ne, %1, %c0_i32_0 : i32
    scf.if %2 {
      %cst_12 = arith.constant 0.000000e+00 : f32
      %14 = vector.broadcast %cst_12 : f32 to vector<512x128xf32>
      %c0_13 = arith.constant 0 : index
      %c0_14 = arith.constant 0 : index
      %15 = vector.load %arg8[%c0_13, %c0_14] : memref<512x128xf32, #tpu.memory_space<vmem>>, vector<512x128xf32>
      tpu.vector_store %arg8[%c0_13, %c0_14], %14 {strides = array<i32>} : memref<512x128xf32, #tpu.memory_space<vmem>>, vector<512x128xf32>,
    } else {
    }
    %c0 = arith.constant 0 : index
    %c0_1 = arith.constant 0 : index
    %3 = vector.load %arg8[%c0, %c0_1] : memref<512x128xf32, #tpu.memory_space<vmem>>, vector<512x128xf32>
    %c0_2 = arith.constant 0 : index
    %c0_3 = arith.constant 0 : index
    %c0_4 = arith.constant 0 : index
    %4 = vector.load %arg4[%c0_2, %c0_3, %c0_4] : memref<1x512x128xbf16, #tpu.memory_space<vmem>>, vector<1x512x128xbf16>
    %5 = vector.shape_cast %4 : vector<1x512x128xbf16> to vector<512x128xbf16>
    %c0_5 = arith.constant 0 : index
    %c0_6 = arith.constant 0 : index
    %c0_7 = arith.constant 0 : index
    %6 = vector.load %arg5[%c0_5, %c0_6, %c0_7] : memref<1x128x128xbf16, #tpu.memory_space<vmem>>, vector<1x128x128xbf16>
    %7 = vector.shape_cast %6 : vector<1x128x128xbf16> to vector<128x128xbf16>
    %cst = arith.constant dense<0.000000e+00> : vector<512x128xf32>
    %8 = tpu.matmul %5, %7, %cst {dimension_numbers = #tpu.dot_dimension_numbers<[1], [0], [0], [1], [0, 0, 1, 1], [], []>} : vector<512x128xbf16>, vector<128x128xbf16>, vector<512x128xf32> -> vector<512x128xf32>
    %9 = arith.addf %3, %8 : vector<512x128xf32>
    %c0_8 = arith.constant 0 : index
    %c0_9 = arith.constant 0 : index
    %10 = vector.load %arg8[%c0_8, %c0_9] : memref<512x128xf32, #tpu.memory_space<vmem>>, vector<512x128xf32>
    tpu.vector_store %arg8[%c0_8, %c0_9], %9 {strides = array<i32>} : memref<512x128xf32, #tpu.memory_space<vmem>>, vector<512x128xf32>,
    %c0_i32_10 = arith.constant 0 : i32
    %11 = arith.cmpi eq, %arg3, %c0_i32_10 : i32
    %12 = arith.extui %11 : i1 to i32
    %c0_i32_11 = arith.constant 0 : i32
    %13 = arith.cmpi ne, %12, %c0_i32_11 : i32
    scf.if %13 {
      %c0_12 = arith.constant 0 : index
      %c0_13 = arith.constant 0 : index
      %14 = vector.load %arg8[%c0_12, %c0_13] : memref<512x128xf32, #tpu.memory_space<vmem>>, vector<512x128xf32>
      %c0_14 = arith.constant 0 : index
      %c0_15 = arith.constant 0 : index
      %15 = vector.load %arg6[%c0_14, %c0_15] : memref<1x128xf32, #tpu.memory_space<vmem>>, vector<1x128xf32>
      %16 = vector.broadcast %15 : vector<1x128xf32> to vector<512x128xf32>
      %17 = arith.addf %14, %16 : vector<512x128xf32>
      %18 = math.tanh %17 : vector<512x128xf32>
      %c0_16 = arith.constant 0 : index
      %c0_17 = arith.constant 0 : index
      %c0_18 = arith.constant 0 : index
      %19 = vector.load %arg7[%c0_16, %c0_17, %c0_18] : memref<1x512x128xf32, #tpu.memory_space<vmem>>, vector<1x512x128xf32>
      %20 = vector.shape_cast %19 : vector<1x512x128xf32> to vector<512x128xf32>
      %21 = vector.shape_cast %18 : vector<512x128xf32> to vector<1x512x128xf32>
      tpu.vector_store %arg7[%c0_16, %c0_17, %c0_18], %21 {strides = array<i32>} : memref<1x512x128xf32, #tpu.memory_space<vmem>>, vector<1x512x128xf32>,
    } else {
    }
    return
  }
  func.func @transform_0(%arg0: i32, %arg1: i32, %arg2: i32, %arg3: i32) -> (i32, i32, i32) {
    %c0_i32 = arith.constant 0 : i32
    return %arg0, %arg1, %arg3 : i32, i32, i32
  }
  func.func @transform_1(%arg0: i32, %arg1: i32, %arg2: i32, %arg3: i32) -> (i32, i32, i32) {
    %c0_i32 = arith.constant 0 : i32
    return %arg0, %arg3, %arg2 : i32, i32, i32
  }
  func.func @transform_2(%arg0: i32, %arg1: i32, %arg2: i32, %arg3: i32) -> (i32, i32) {
    %c0_i32 = arith.constant 0 : i32
    %c0_i32_0 = arith.constant 0 : i32
    return %c0_i32, %arg2 : i32, i32
  }
  func.func @transform_3(%arg0: i32, %arg1: i32, %arg2: i32, %arg3: i32) -> (i32, i32, i32) {
    %c0_i32 = arith.constant 0 : i32
    return %arg0, %arg1, %arg2 : i32, i32, i32
  }
}

</mosaic_0001>

<bundles_post_ra>
// kernel: _lambda_.6
= control target key start
LH: loop header
LB: loop body
LE: loop exit
PB: predicated region body
PF: predicated region fallthrough
CT: control target
= control target key end

     0   :  { %s2187_s1 = inlined_call_operand.vmem [shape: bf16[1,128,128], index: 1, kind: input, shape index: {}]   ;;  %s2188_s0 = inlined_call_operand.vmem [shape: bf16[1,512,128], index: 0, kind: input, shape index: {}]   ;;  %s2189_s2 = inlined_call_operand.vmem [shape: f32[1,128], index: 2, kind: input, shape index: {}]   ;;  %s2190_s3 = inlined_call_operand.vmem [shape: bf16[1,512,128], index: 3, kind: output, shape index: {}]  }
   0x1   :  { %v1842_v0 = vld [vmem:[%s2187_s1] sm:$0xff]   ;;  %v1843_v1 = vld [vmem:[%s2187_s1 + $0x8] sm:$0xff]   ;;  %v1844_v2 = vld [vmem:[%s2187_s1 + $0x10] sm:$0xff]  }
   0x2   :  { %1746 = vmatprep.subr.bf16.mxu0 %v1842_v0  ;;  %1826 = vmatprep.subr.bf16.mxu1 %v1842_v0  ;;  %v1845_v3 = vld [vmem:[%s2187_s1 + $0x18] sm:$0xff]   ;;  %v1850_v4 = vld [vmem:[%s2188_s0] sm:$0xff]   ;;  %v1847_v7 = vld [vmem:[%s2187_s1 + $0x28] sm:$0xff]  }
   0x3   :  { %1747 = vmatpush3.bf16.msra.mxu0 %v1842_v0  ;;  %1834 = vmatpush3.bf16.msra.mxu1 %v1842_v0  ;;  %v1851_v5 = vld [vmem:[%s2188_s0 + $0x80] sm:$0xff]   ;;  %v1848_v8 = vld [vmem:[%s2187_s1 + $0x30] sm:$0xff]   ;;  %v1849_v9 = vld [vmem:[%s2187_s1 + $0x38] sm:$0xff]  }
   0x4   :  { %1748 = vmatprep.subr.bf16.mxu0 %v1843_v1  ;;  %1827 = vmatprep.subr.bf16.mxu1 %v1843_v1  ;;  %v1846_v6 = vld [vmem:[%s2187_s1 + $0x20] sm:$0xff]   ;;  %v1852_v10 = vld [vmem:[%s2188_s0 + $0x8] sm:$0xff]   ;;  %v1854_v12 = vld [vmem:[%s2188_s0 + $0x10] sm:$0xff]  }
   0x5   :  { %1762 = vmatprep.mubr.bf16.mxu0 %v1850_v4  ;;  %1794 = vmatprep.mubr.bf16.mxu1 %v1851_v5  ;;  %v1853_v11 = vld [vmem:[%s2188_s0 + $0x88] sm:$0xff]   ;;  %v1855_v13 = vld [vmem:[%s2188_s0 + $0x90] sm:$0xff]   ;;  %v1856_v14 = vld [vmem:[%s2188_s0 + $0x18] sm:$0xff]  }
   0x6   :  { %v1857_v15 = vld [vmem:[%s2188_s0 + $0x98] sm:$0xff]   ;;  %v1858_v16 = vld [vmem:[%s2188_s0 + $0x20] sm:$0xff]   ;;  %v1860_v18 = vld [vmem:[%s2188_s0 + $0x28] sm:$0xff]  }
   0x7   :  { %1749 = vmatpush3.bf16.msra.mxu0 %v1843_v1  ;;  %1835 = vmatpush3.bf16.msra.mxu1 %v1843_v1  ;;  %v1859_v17 = vld [vmem:[%s2188_s0 + $0xa0] sm:$0xff]   ;;  %v1861_v19 = vld [vmem:[%s2188_s0 + $0xa8] sm:$0xff]   ;;  %v1862_v20 = vld [vmem:[%s2188_s0 + $0x30] sm:$0xff]  }
   0x8   :  { %1750 = vmatprep.subr.bf16.mxu0 %v1844_v2  ;;  %1828 = vmatprep.subr.bf16.mxu1 %v1844_v2  ;;  %v1863_v21 = vld [vmem:[%s2188_s0 + $0xb0] sm:$0xff]   ;;  %v1864_v22 = vld [vmem:[%s2188_s0 + $0x38] sm:$0xff]   ;;  %v1866_v24 = vld [vmem:[%s2188_s0 + $0x40] sm:$0xff]  }
   0x9   :  { %v1865_v23 = vld [vmem:[%s2188_s0 + $0xb8] sm:$0xff]   ;;  %v1867_v25 = vld [vmem:[%s2188_s0 + $0xc0] sm:$0xff]   ;;  %v1868_v26 = vld [vmem:[%s2188_s0 + $0x48] sm:$0xff]  }
   0xa   :  { %v1869_v27 = vld [vmem:[%s2188_s0 + $0xc8] sm:$0xff]   ;;  %v1870_v28 = vld [vmem:[%s2188_s0 + $0x50] sm:$0xff]   ;;  %v1872_v30 = vld [vmem:[%s2188_s0 + $0x58] sm:$0xff]  }
   0xb   :  { %1751 = vmatpush3.bf16.msra.mxu0 %v1844_v2  ;;  %1836 = vmatpush3.bf16.msra.mxu1 %v1844_v2  ;;  %v1871_v29 = vld [vmem:[%s2188_s0 + $0xd0] sm:$0xff]   ;;  %v1873_v31 = vld [vmem:[%s2188_s0 + $0xd8] sm:$0xff]   ;;  %v1874_v32 = vld [vmem:[%s2188_s0 + $0x60] sm:$0xff]  }
   0xc   :  { %1752 = vmatprep.subr.bf16.mxu0 %v1845_v3  ;;  %1829 = vmatprep.subr.bf16.mxu1 %v1845_v3  ;;  %v1875_v33 = vld [vmem:[%s2188_s0 + $0xe0] sm:$0xff]   ;;  %v1876_v34 = vld [vmem:[%s2188_s0 + $0x68] sm:$0xff]   ;;  %v1878_v36 = vld [vmem:[%s2188_s0 + $0x70] sm:$0xff]  }
   0xd   :  { %v1877_v35 = vld [vmem:[%s2188_s0 + $0xe8] sm:$0xff]   ;;  %v1879_v37 = vld [vmem:[%s2188_s0 + $0xf0] sm:$0xff]   ;;  %v1880_v38 = vld [vmem:[%s2188_s0 + $0x78] sm:$0xff]  }
   0xe   :  { %v1881_v39 = vld [vmem:[%s2188_s0 + $0xf8] sm:$0xff]   ;;  %v2025_v41 = vld [vmem:[%s2189_s2] ss:$0 sm:$0xff] }
   0xf   :  { %1753 = vmatpush3.bf16.msra.mxu0 %v1845_v3  ;;  %1837 = vmatpush3.bf16.msra.mxu1 %v1845_v3 }
  0x10   :  { %1754 = vmatprep.subr.bf16.mxu0 %v1846_v6  ;;  %1830 = vmatprep.subr.bf16.mxu1 %v1846_v6 }
  0x13   :  { %1755 = vmatpush3.bf16.msra.mxu0 %v1846_v6  ;;  %1838 = vmatpush3.bf16.msra.mxu1 %v1846_v6 }
  0x14   :  { %1756 = vmatprep.subr.bf16.mxu0 %v1847_v7  ;;  %1831 = vmatprep.subr.bf16.mxu1 %v1847_v7 }
  0x17   :  { %1757 = vmatpush3.bf16.msra.mxu0 %v1847_v7  ;;  %1839 = vmatpush3.bf16.msra.mxu1 %v1847_v7 }
  0x18   :  { %1758 = vmatprep.subr.bf16.mxu0 %v1848_v8  ;;  %1832 = vmatprep.subr.bf16.mxu1 %v1848_v8 }
  0x1b   :  { %1759 = vmatpush3.bf16.msra.mxu0 %v1848_v8  ;;  %1840 = vmatpush3.bf16.msra.mxu1 %v1848_v8 }
  0x1c   :  { %1760 = vmatprep.subr.bf16.mxu0 %v1849_v9  ;;  %1833 = vmatprep.subr.bf16.mxu1 %v1849_v9 }
  0x1f   :  { %1761 = vmatpush3.bf16.msra.mxu0 %v1849_v9  ;;  %1841 = vmatpush3.bf16.msra.mxu1 %v1849_v9 }
  0x22   :  { %1763 = vmatmul.mubr.bf16.vlgmr.msra.gmra.mrb[0].mxu0 %v1852_v10  ;;  %1795 = vmatmul.mubr.bf16.vlgmr.msra.gmra.mrb[0].mxu1 %v1853_v11 }
  0x23   :  { %1766 = vmatprep.mubr.bf16.mxu0 %v1854_v12  ;;  %1798 = vmatprep.mubr.bf16.mxu1 %v1855_v13 }
  0x2a   :  { %1767 = vmatmul.mubr.bf16.gmra.mrb[4].mxu0 %v1856_v14  ;;  %1799 = vmatmul.mubr.bf16.gmra.mrb[4].mxu1 %v1857_v15 }
  0x2b   :  { %1770 = vmatprep.mubr.bf16.mxu0 %v1858_v16  ;;  %1802 = vmatprep.mubr.bf16.mxu1 %v1859_v17 }
  0x32   :  { %1771 = vmatmul.mubr.bf16.gmra.mrb[8].mxu0 %v1860_v18  ;;  %1803 = vmatmul.mubr.bf16.gmra.mrb[8].mxu1 %v1861_v19 }
  0x33   :  { %1774 = vmatprep.mubr.bf16.mxu0 %v1862_v20  ;;  %1806 = vmatprep.mubr.bf16.mxu1 %v1863_v21 }
  0x3a   :  { %1775 = vmatmul.mubr.bf16.gmra.mrb[12].mxu0 %v1864_v22  ;;  %1807 = vmatmul.mubr.bf16.gmra.mrb[12].mxu1 %v1865_v23 }
  0x3b   :  { %1778 = vmatprep.mubr.bf16.mxu0 %v1866_v24  ;;  %1810 = vmatprep.mubr.bf16.mxu1 %v1867_v25 }
  0x42   :  { %1779 = vmatmul.mubr.bf16.gmra.mrb[16].mxu0 %v1868_v26  ;;  %1811 = vmatmul.mubr.bf16.gmra.mrb[16].mxu1 %v1869_v27 }
  0x43   :  { %1782 = vmatprep.mubr.bf16.mxu0 %v1870_v28  ;;  %1814 = vmatprep.mubr.bf16.mxu1 %v1871_v29 }
  0x4a   :  { %1783 = vmatmul.mubr.bf16.gmra.mrb[20].mxu0 %v1872_v30  ;;  %1815 = vmatmul.mubr.bf16.gmra.mrb[20].mxu1 %v1873_v31 }
  0x4b   :  { %1786 = vmatprep.mubr.bf16.mxu0 %v1874_v32  ;;  %1818 = vmatprep.mubr.bf16.mxu1 %v1875_v33 }
  0x52   :  { %1787 = vmatmul.mubr.bf16.gmra.mrb[24].mxu0 %v1876_v34  ;;  %1819 = vmatmul.mubr.bf16.gmra.mrb[24].mxu1 %v1877_v35 }
  0x53   :  { %1790 = vmatprep.mubr.bf16.mxu0 %v1878_v36  ;;  %1822 = vmatprep.mubr.bf16.mxu1 %v1879_v37 }
  0x5a   :  { %1791 = vmatmul.mubr.bf16.gmra.mrb[28].mxu0 %v1880_v38  ;;  %1823 = vmatmul.mubr.bf16.gmra.mrb[28].mxu1 %v1881_v39 }
  0xf5   :  { %v1764_v40 = vpop.f32.mrb[0].mxu0  ;;  %v1796_v42 = vpop.f32.mrb[0].mxu1 }
  0xf6   :  { %v501_v43 = vpop.f32.mrb[1].mxu0  ;;  %v629_v44 = vpop.f32.mrb[1].mxu1  ;;  %v960_v47 = vadd.f32 %v1764_v40, %v2025_v41  ;;  %v992_v48 = vadd.f32 %v1796_v42, %v2025_v41 }
  0xf7   :  { %v1765_v45 = vpop.f32.mrb[2].mxu0  ;;  %v1797_v46 = vpop.f32.mrb[2].mxu1  ;;  %v958_v53 = vadd.f32 %v2025_v41, %v501_v43  ;;  %v990_v54 = vadd.f32 %v2025_v41, %v629_v44 }
  0xf8   :  { %v961_v49 = vadd.f32 %v1765_v45, %v2025_v41  ;;  %v993_v50 = vadd.f32 %v1797_v46, %v2025_v41  ;;  %v504_v51 = vpop.f32.mrb[3].mxu0  ;;  %v632_v52 = vpop.f32.mrb[3].mxu1 }
  0xf9   :  { %v959_v55 = vadd.f32 %v2025_v41, %v504_v51  ;;  %v991_v56 = vadd.f32 %v2025_v41, %v632_v52 }
  0xfa   :  { %v1523_v57 = vpack.c.bf16 %v961_v49, %v960_v47  ;;  %v1603_v58 = vpack.c.bf16 %v993_v50, %v992_v48 }
  0xfb   :  { %v1518_v59 = vpack.c.bf16 %v959_v55, %v958_v53  ;;  %v1598_v60 = vpack.c.bf16 %v991_v56, %v990_v54 }
  0xfc   :  { %1675 = vst [vmem:[%s2190_s3 + $0x8] sm:$0xff] %v1523_v57   ;;  %1691 = vst [vmem:[%s2190_s3 + $0x88] sm:$0xff] %v1603_v58  }
  0xfd   :  { %1519 = vst [vmem:[%s2190_s3] sm:$0xff] %v1518_v59   ;;  %1690 = vst [vmem:[%s2190_s3 + $0x80] sm:$0xff] %v1598_v60   ;;  %v1768_v61 = vpop.f32.mrb[4].mxu0  ;;  %v1800_v62 = vpop.f32.mrb[4].mxu1 }
  0xfe   :  { %v517_v63 = vpop.f32.mrb[5].mxu0  ;;  %v645_v0 = vpop.f32.mrb[5].mxu1  ;;  %v964_v3 = vadd.f32 %v1768_v61, %v2025_v41  ;;  %v996_v4 = vadd.f32 %v1800_v62, %v2025_v41 }
  0xff   :  { %v1769_v1 = vpop.f32.mrb[6].mxu0  ;;  %v1801_v2 = vpop.f32.mrb[6].mxu1  ;;  %v962_v9 = vadd.f32 %v2025_v41, %v517_v63  ;;  %v994_v10 = vadd.f32 %v2025_v41, %v645_v0 }
 0x100   :  { %v965_v5 = vadd.f32 %v1769_v1, %v2025_v41  ;;  %v997_v6 = vadd.f32 %v1801_v2, %v2025_v41  ;;  %v520_v7 = vpop.f32.mrb[7].mxu0  ;;  %v648_v8 = vpop.f32.mrb[7].mxu1 }
 0x101   :  { %v963_v11 = vadd.f32 %v2025_v41, %v520_v7  ;;  %v995_v12 = vadd.f32 %v2025_v41, %v648_v8 }
 0x102   :  { %v1533_v13 = vpack.c.bf16 %v965_v5, %v964_v3  ;;  %v1613_v14 = vpack.c.bf16 %v997_v6, %v996_v4 }
 0x103   :  { %v1528_v15 = vpack.c.bf16 %v963_v11, %v962_v9  ;;  %v1608_v16 = vpack.c.bf16 %v995_v12, %v994_v10 }
 0x104   :  { %1677 = vst [vmem:[%s2190_s3 + $0x18] sm:$0xff] %v1533_v13   ;;  %1693 = vst [vmem:[%s2190_s3 + $0x98] sm:$0xff] %v1613_v14  }
 0x105   :  { %1676 = vst [vmem:[%s2190_s3 + $0x10] sm:$0xff] %v1528_v15   ;;  %1692 = vst [vmem:[%s2190_s3 + $0x90] sm:$0xff] %v1608_v16   ;;  %v1772_v17 = vpop.f32.mrb[8].mxu0  ;;  %v1804_v18 = vpop.f32.mrb[8].mxu1 }
 0x106   :  { %v533_v19 = vpop.f32.mrb[9].mxu0  ;;  %v661_v20 = vpop.f32.mrb[9].mxu1  ;;  %v968_v23 = vadd.f32 %v1772_v17, %v2025_v41  ;;  %v1000_v24 = vadd.f32 %v1804_v18, %v2025_v41 }
 0x107   :  { %v1773_v21 = vpop.f32.mrb[10].mxu0  ;;  %v1805_v22 = vpop.f32.mrb[10].mxu1  ;;  %v966_v29 = vadd.f32 %v2025_v41, %v533_v19  ;;  %v998_v30 = vadd.f32 %v2025_v41, %v661_v20 }
 0x108   :  { %v969_v25 = vadd.f32 %v1773_v21, %v2025_v41  ;;  %v1001_v26 = vadd.f32 %v1805_v22, %v2025_v41  ;;  %v536_v27 = vpop.f32.mrb[11].mxu0  ;;  %v664_v28 = vpop.f32.mrb[11].mxu1 }
 0x109   :  { %v967_v31 = vadd.f32 %v2025_v41, %v536_v27  ;;  %v999_v32 = vadd.f32 %v2025_v41, %v664_v28 }
 0x10a   :  { %v1543_v33 = vpack.c.bf16 %v969_v25, %v968_v23  ;;  %v1623_v34 = vpack.c.bf16 %v1001_v26, %v1000_v24 }
 0x10b   :  { %v1538_v35 = vpack.c.bf16 %v967_v31, %v966_v29  ;;  %v1618_v36 = vpack.c.bf16 %v999_v32, %v998_v30 }
 0x10c   :  { %1679 = vst [vmem:[%s2190_s3 + $0x28] sm:$0xff] %v1543_v33   ;;  %1695 = vst [vmem:[%s2190_s3 + $0xa8] sm:$0xff] %v1623_v34  }
 0x10d   :  { %1678 = vst [vmem:[%s2190_s3 + $0x20] sm:$0xff] %v1538_v35   ;;  %1694 = vst [vmem:[%s2190_s3 + $0xa0] sm:$0xff] %v1618_v36   ;;  %v1776_v37 = vpop.f32.mrb[12].mxu0  ;;  %v1808_v38 = vpop.f32.mrb[12].mxu1 }
 0x10e   :  { %v549_v39 = vpop.f32.mrb[13].mxu0  ;;  %v677_v40 = vpop.f32.mrb[13].mxu1  ;;  %v972_v44 = vadd.f32 %v1776_v37, %v2025_v41  ;;  %v1004_v45 = vadd.f32 %v1808_v38, %v2025_v41 }
 0x10f   :  { %v1777_v42 = vpop.f32.mrb[14].mxu0  ;;  %v1809_v43 = vpop.f32.mrb[14].mxu1  ;;  %v970_v50 = vadd.f32 %v2025_v41, %v549_v39  ;;  %v1002_v51 = vadd.f32 %v2025_v41, %v677_v40 }
 0x110   :  { %v973_v46 = vadd.f32 %v1777_v42, %v2025_v41  ;;  %v1005_v47 = vadd.f32 %v1809_v43, %v2025_v41  ;;  %v552_v48 = vpop.f32.mrb[15].mxu0  ;;  %v680_v49 = vpop.f32.mrb[15].mxu1 }
 0x111   :  { %v971_v52 = vadd.f32 %v2025_v41, %v552_v48  ;;  %v1003_v53 = vadd.f32 %v2025_v41, %v680_v49 }
 0x112   :  { %v1553_v54 = vpack.c.bf16 %v973_v46, %v972_v44  ;;  %v1633_v55 = vpack.c.bf16 %v1005_v47, %v1004_v45 }
 0x113   :  { %v1548_v56 = vpack.c.bf16 %v971_v52, %v970_v50  ;;  %v1628_v57 = vpack.c.bf16 %v1003_v53, %v1002_v51 }
 0x114   :  { %1681 = vst [vmem:[%s2190_s3 + $0x38] sm:$0xff] %v1553_v54   ;;  %1697 = vst [vmem:[%s2190_s3 + $0xb8] sm:$0xff] %v1633_v55  }
 0x115   :  { %1680 = vst [vmem:[%s2190_s3 + $0x30] sm:$0xff] %v1548_v56   ;;  %1696 = vst [vmem:[%s2190_s3 + $0xb0] sm:$0xff] %v1628_v57   ;;  %v1780_v58 = vpop.f32.mrb[16].mxu0  ;;  %v1812_v59 = vpop.f32.mrb[16].mxu1 }
 0x116   :  { %v565_v60 = vpop.f32.mrb[17].mxu0  ;;  %v693_v61 = vpop.f32.mrb[17].mxu1  ;;  %v976_v0 = vadd.f32 %v1780_v58, %v2025_v41  ;;  %v1008_v1 = vadd.f32 %v1812_v59, %v2025_v41 }
 0x117   :  { %v1781_v62 = vpop.f32.mrb[18].mxu0  ;;  %v1813_v63 = vpop.f32.mrb[18].mxu1  ;;  %v974_v6 = vadd.f32 %v2025_v41, %v565_v60  ;;  %v1006_v7 = vadd.f32 %v2025_v41, %v693_v61 }
 0x118   :  { %v977_v2 = vadd.f32 %v1781_v62, %v2025_v41  ;;  %v1009_v3 = vadd.f32 %v1813_v63, %v2025_v41  ;;  %v568_v4 = vpop.f32.mrb[19].mxu0  ;;  %v696_v5 = vpop.f32.mrb[19].mxu1 }
 0x119   :  { %v975_v8 = vadd.f32 %v2025_v41, %v568_v4  ;;  %v1007_v9 = vadd.f32 %v2025_v41, %v696_v5 }
 0x11a   :  { %v1563_v10 = vpack.c.bf16 %v977_v2, %v976_v0  ;;  %v1643_v11 = vpack.c.bf16 %v1009_v3, %v1008_v1 }
 0x11b   :  { %v1558_v12 = vpack.c.bf16 %v975_v8, %v974_v6  ;;  %v1638_v13 = vpack.c.bf16 %v1007_v9, %v1006_v7 }
 0x11c   :  { %1683 = vst [vmem:[%s2190_s3 + $0x48] sm:$0xff] %v1563_v10   ;;  %1699 = vst [vmem:[%s2190_s3 + $0xc8] sm:$0xff] %v1643_v11  }
 0x11d   :  { %1682 = vst [vmem:[%s2190_s3 + $0x40] sm:$0xff] %v1558_v12   ;;  %1698 = vst [vmem:[%s2190_s3 + $0xc0] sm:$0xff] %v1638_v13   ;;  %v1784_v14 = vpop.f32.mrb[20].mxu0  ;;  %v1816_v15 = vpop.f32.mrb[20].mxu1 }
 0x11e   :  { %v581_v16 = vpop.f32.mrb[21].mxu0  ;;  %v709_v17 = vpop.f32.mrb[21].mxu1  ;;  %v980_v20 = vadd.f32 %v1784_v14, %v2025_v41  ;;  %v1012_v21 = vadd.f32 %v1816_v15, %v2025_v41 }
 0x11f   :  { %v1785_v18 = vpop.f32.mrb[22].mxu0  ;;  %v1817_v19 = vpop.f32.mrb[22].mxu1  ;;  %v978_v26 = vadd.f32 %v2025_v41, %v581_v16  ;;  %v1010_v27 = vadd.f32 %v2025_v41, %v709_v17 }
 0x120   :  { %v981_v22 = vadd.f32 %v1785_v18, %v2025_v41  ;;  %v1013_v23 = vadd.f32 %v1817_v19, %v2025_v41  ;;  %v584_v24 = vpop.f32.mrb[23].mxu0  ;;  %v712_v25 = vpop.f32.mrb[23].mxu1 }
 0x121   :  { %v979_v28 = vadd.f32 %v2025_v41, %v584_v24  ;;  %v1011_v29 = vadd.f32 %v2025_v41, %v712_v25 }
 0x122   :  { %v1573_v30 = vpack.c.bf16 %v981_v22, %v980_v20  ;;  %v1653_v31 = vpack.c.bf16 %v1013_v23, %v1012_v21 }
 0x123   :  { %v1568_v32 = vpack.c.bf16 %v979_v28, %v978_v26  ;;  %v1648_v33 = vpack.c.bf16 %v1011_v29, %v1010_v27 }
 0x124   :  { %1685 = vst [vmem:[%s2190_s3 + $0x58] sm:$0xff] %v1573_v30   ;;  %1701 = vst [vmem:[%s2190_s3 + $0xd8] sm:$0xff] %v1653_v31  }
 0x125   :  { %1684 = vst [vmem:[%s2190_s3 + $0x50] sm:$0xff] %v1568_v32   ;;  %1700 = vst [vmem:[%s2190_s3 + $0xd0] sm:$0xff] %v1648_v33   ;;  %v1788_v34 = vpop.f32.mrb[24].mxu0  ;;  %v1820_v35 = vpop.f32.mrb[24].mxu1 }
 0x126   :  { %v597_v36 = vpop.f32.mrb[25].mxu0  ;;  %v725_v37 = vpop.f32.mrb[25].mxu1  ;;  %v984_v40 = vadd.f32 %v1788_v34, %v2025_v41  ;;  %v1016_v42 = vadd.f32 %v1820_v35, %v2025_v41 }
 0x127   :  { %v1789_v38 = vpop.f32.mrb[26].mxu0  ;;  %v1821_v39 = vpop.f32.mrb[26].mxu1  ;;  %v982_v47 = vadd.f32 %v2025_v41, %v597_v36  ;;  %v1014_v48 = vadd.f32 %v2025_v41, %v725_v37 }
 0x128   :  { %v985_v43 = vadd.f32 %v1789_v38, %v2025_v41  ;;  %v1017_v44 = vadd.f32 %v1821_v39, %v2025_v41  ;;  %v600_v45 = vpop.f32.mrb[27].mxu0  ;;  %v728_v46 = vpop.f32.mrb[27].mxu1 }
 0x129   :  { %v983_v49 = vadd.f32 %v2025_v41, %v600_v45  ;;  %v1015_v50 = vadd.f32 %v2025_v41, %v728_v46 }
 0x12a   :  { %v1583_v51 = vpack.c.bf16 %v985_v43, %v984_v40  ;;  %v1663_v52 = vpack.c.bf16 %v1017_v44, %v1016_v42 }
 0x12b   :  { %v1578_v53 = vpack.c.bf16 %v983_v49, %v982_v47  ;;  %v1658_v54 = vpack.c.bf16 %v1015_v50, %v1014_v48 }
 0x12c   :  { %1687 = vst [vmem:[%s2190_s3 + $0x68] sm:$0xff] %v1583_v51   ;;  %1703 = vst [vmem:[%s2190_s3 + $0xe8] sm:$0xff] %v1663_v52  }
 0x12d   :  { %1686 = vst [vmem:[%s2190_s3 + $0x60] sm:$0xff] %v1578_v53   ;;  %1702 = vst [vmem:[%s2190_s3 + $0xe0] sm:$0xff] %v1658_v54   ;;  %v1792_v55 = vpop.f32.mrb[28].mxu0  ;;  %v1824_v56 = vpop.f32.mrb[28].mxu1 }
 0x12e   :  { %v613_v57 = vpop.f32.mrb[29].mxu0  ;;  %v741_v58 = vpop.f32.mrb[29].mxu1  ;;  %v988_v61 = vadd.f32 %v1792_v55, %v2025_v41  ;;  %v1020_v62 = vadd.f32 %v1824_v56, %v2025_v41 }
 0x12f   :  { %v1793_v59 = vpop.f32.mrb[30].mxu0  ;;  %v1825_v60 = vpop.f32.mrb[30].mxu1  ;;  %v986_v3 = vadd.f32 %v2025_v41, %v613_v57  ;;  %v1018_v4 = vadd.f32 %v2025_v41, %v741_v58 }
 0x130   :  { %v989_v63 = vadd.f32 %v1793_v59, %v2025_v41  ;;  %v1021_v0 = vadd.f32 %v1825_v60, %v2025_v41  ;;  %v616_v1 = vpop.f32.mrb[31].mxu0  ;;  %v744_v2 = vpop.f32.mrb[31].mxu1 }
 0x131   :  { %v987_v5 = vadd.f32 %v2025_v41, %v616_v1  ;;  %v1019_v6 = vadd.f32 %v2025_v41, %v744_v2 }
 0x132   :  { %v1593_v7 = vpack.c.bf16 %v989_v63, %v988_v61  ;;  %v1673_v8 = vpack.c.bf16 %v1021_v0, %v1020_v62 }
 0x133   :  { %v1588_v9 = vpack.c.bf16 %v987_v5, %v986_v3  ;;  %v1668_v10 = vpack.c.bf16 %v1019_v6, %v1018_v4 }
 0x134   :  { %1689 = vst [vmem:[%s2190_s3 + $0x78] sm:$0xff] %v1593_v7   ;;  %1705 = vst [vmem:[%s2190_s3 + $0xf8] sm:$0xff] %v1673_v8  }
 0x135   :  { %1688 = vst [vmem:[%s2190_s3 + $0x70] sm:$0xff] %v1588_v9   ;;  %1704 = vst [vmem:[%s2190_s3 + $0xf0] sm:$0xff] %v1668_v10  }

// kernel: _lambda_.7
= control target key start
LH: loop header
LB: loop body
LE: loop exit
PB: predicated region body
PF: predicated region fallthrough
CT: control target
= control target key end

     0   :  { %vm490_vm0 = vcmask 1040384   ;;  %s798_s1 = inlined_call_operand.vmem [shape: bf16[1,128,128], index: 1, kind: input, shape index: {}]   ;;  %s799_s0 = inlined_call_operand.vmem [shape: bf16[1,128,128], index: 0, kind: input, shape index: {}]   ;;  %s800_s2 = inlined_call_operand.vmem [shape: f32[1,128], index: 2, kind: input, shape index: {}]   ;;  %s801_s3 = inlined_call_operand.vmem [shape: bf16[1,128,128], index: 3, kind: output, shape index: {0}]   ;;  %s802_s4 = inlined_call_operand.vmem [shape: f32[1,8,128], index: 4, kind: output, shape index: {1}]  }
   0x1   :  { %v661_v0 = vld [vmem:[%s798_s1] sm:$0xff]   ;;  %v662_v1 = vld [vmem:[%s798_s1 + $0x8] sm:$0xff]   ;;  %v663_v2 = vld [vmem:[%s798_s1 + $0x10] sm:$0xff]  }
   0x2   :  { %613 = vmatprep.subr.bf16.mxu0 %v661_v0  ;;  %645 = vmatprep.subr.bf16.mxu1 %v661_v0  ;;  %v664_v3 = vld [vmem:[%s798_s1 + $0x18] sm:$0xff]   ;;  %v669_v4 = vld [vmem:[%s799_s0] sm:$0xff]   ;;  %v666_v7 = vld [vmem:[%s798_s1 + $0x28] sm:$0xff]  }
   0x3   :  { %614 = vmatpush3.bf16.msra.mxu0 %v661_v0  ;;  %653 = vmatpush3.bf16.msra.mxu1 %v661_v0  ;;  %v665_v5 = vld [vmem:[%s798_s1 + $0x20] sm:$0xff]   ;;  %v667_v8 = vld [vmem:[%s798_s1 + $0x30] sm:$0xff]   ;;  %v668_v9 = vld [vmem:[%s798_s1 + $0x38] sm:$0xff]  }
   0x4   :  { %615 = vmatprep.subr.bf16.mxu0 %v662_v1  ;;  %646 = vmatprep.subr.bf16.mxu1 %v662_v1  ;;  %v673_v6 = vld [vmem:[%s799_s0 + $0x20] sm:$0xff]   ;;  %v670_v10 = vld [vmem:[%s799_s0 + $0x8] sm:$0xff]   ;;  %v671_v12 = vld [vmem:[%s799_s0 + $0x10] sm:$0xff]  }
   0x5   :  { %629 = vmatprep.mubr.bf16.mxu0 %v669_v4  ;;  %637 = vmatprep.mubr.bf16.mxu1 %v673_v6  ;;  %v674_v11 = vld [vmem:[%s799_s0 + $0x28] sm:$0xff]   ;;  %v675_v13 = vld [vmem:[%s799_s0 + $0x30] sm:$0xff]   ;;  %v672_v14 = vld [vmem:[%s799_s0 + $0x18] sm:$0xff]  }
   0x6   :  { %v676_v15 = vld [vmem:[%s799_s0 + $0x38] sm:$0xff]   ;;  %v517_v16 = vld [vmem:[%s800_s2] ss:$0 sm:$0xff] }
   0x7   :  { %616 = vmatpush3.bf16.msra.mxu0 %v662_v1  ;;  %654 = vmatpush3.bf16.msra.mxu1 %v662_v1 }
   0x8   :  { %617 = vmatprep.subr.bf16.mxu0 %v663_v2  ;;  %647 = vmatprep.subr.bf16.mxu1 %v663_v2 }
   0xb   :  { %618 = vmatpush3.bf16.msra.mxu0 %v663_v2  ;;  %655 = vmatpush3.bf16.msra.mxu1 %v663_v2 }
   0xc   :  { %619 = vmatprep.subr.bf16.mxu0 %v664_v3  ;;  %648 = vmatprep.subr.bf16.mxu1 %v664_v3 }
   0xf   :  { %620 = vmatpush3.bf16.msra.mxu0 %v664_v3  ;;  %656 = vmatpush3.bf16.msra.mxu1 %v664_v3 }
  0x10   :  { %621 = vmatprep.subr.bf16.mxu0 %v665_v5  ;;  %649 = vmatprep.subr.bf16.mxu1 %v665_v5 }
  0x13   :  { %622 = vmatpush3.bf16.msra.mxu0 %v665_v5  ;;  %657 = vmatpush3.bf16.msra.mxu1 %v665_v5 }
  0x14   :  { %623 = vmatprep.subr.bf16.mxu0 %v666_v7  ;;  %650 = vmatprep.subr.bf16.mxu1 %v666_v7 }
  0x17   :  { %624 = vmatpush3.bf16.msra.mxu0 %v666_v7  ;;  %658 = vmatpush3.bf16.msra.mxu1 %v666_v7 }
  0x18   :  { %625 = vmatprep.subr.bf16.mxu0 %v667_v8  ;;  %651 = vmatprep.subr.bf16.mxu1 %v667_v8 }
  0x1b   :  { %626 = vmatpush3.bf16.msra.mxu0 %v667_v8  ;;  %659 = vmatpush3.bf16.msra.mxu1 %v667_v8 }
  0x1c   :  { %627 = vmatprep.subr.bf16.mxu0 %v668_v9  ;;  %652 = vmatprep.subr.bf16.mxu1 %v668_v9 }
  0x1f   :  { %628 = vmatpush3.bf16.msra.mxu0 %v668_v9  ;;  %660 = vmatpush3.bf16.msra.mxu1 %v668_v9 }
  0x22   :  { %630 = vmatmul.mubr.bf16.vlgmr.msra.gmra.mrb[0].mxu0 %v670_v10  ;;  %638 = vmatmul.mubr.bf16.vlgmr.msra.gmra.mrb[0].mxu1 %v674_v11 }
  0x23   :  { %633 = vmatprep.mubr.bf16.mxu0 %v671_v12  ;;  %641 = vmatprep.mubr.bf16.mxu1 %v675_v13 }
  0x2a   :  { %634 = vmatmul.mubr.bf16.gmra.mrb[4].mxu0 %v672_v14  ;;  %642 = vmatmul.mubr.bf16.gmra.mrb[4].mxu1 %v676_v15 }
  0xf5   :  { %v631_v17 = vpop.f32.mrb[0].mxu0  ;;  %v753_v18 = vpop.f32.mrb[0].mxu1 }
  0xf6   :  { %v215_v19 = vpop.f32.mrb[1].mxu0  ;;  %v346_v20 = vadd.f32 %v753_v18, %v517_v16  ;;  %v756_v21 = vpop.f32.mrb[1].mxu1  ;;  %v338_v22 = vadd.f32 %v631_v17, %v517_v16  ;;  %v455_v36 = vmul.f32 %v631_v17, %v631_v17 }
  0xf7   :  { %v632_v23 = vpop.f32.mrb[2].mxu0  ;;  %v344_v24 = vadd.f32 %v517_v16, %v756_v21  ;;  %v759_v25 = vpop.f32.mrb[2].mxu1  ;;  %v336_v26 = vadd.f32 %v517_v16, %v215_v19  ;;  %v453_v27 = vmul.f32 %v215_v19, %v215_v19  ;;  %v461_v14 = vmul.f32 %v756_v21, %v756_v21 }
  0xf8   :  { %v339_v28 = vadd.f32 %v632_v23, %v517_v16  ;;  %v218_v29 = vpop.f32.mrb[3].mxu0  ;;  %v347_v30 = vadd.f32 %v759_v25, %v517_v16  ;;  %v250_v31 = vpop.f32.mrb[3].mxu1  ;;  %v456_v43 = vmul.f32 %v632_v23, %v632_v23 }
  0xf9   :  { %v337_v32 = vadd.f32 %v517_v16, %v218_v29  ;;  %v432_v33 = vadd.f32 %v218_v29, %v215_v19  ;;  %v454_v34 = vmul.f32 %v218_v29, %v218_v29  ;;  %v345_v35 = vadd.f32 %v517_v16, %v250_v31 }
  0xfa   :  { %v558_v37 = vpack.c.bf16 %v339_v28, %v338_v22  ;;  %v578_v38 = vpack.c.bf16 %v347_v30, %v346_v20  ;;  %v462_v20 = vmul.f32 %v250_v31, %v250_v31  ;;  %v463_v22 = vmul.f32 %v753_v18, %v753_v18 }
  0xfb   :  { %v553_v39 = vpack.c.bf16 %v337_v32, %v336_v26  ;;  %v433_v40 = vadd.f32 %v631_v17, %v432_v33  ;;  %v469_v41 = vadd.f32 %v454_v34, %v453_v27  ;;  %v573_v42 = vpack.c.bf16 %v345_v35, %v344_v24 }
  0xfc   :  { %590 = vst [vmem:[%s801_s3 + $0x8] sm:$0xff] %v558_v37   ;;  %594 = vst [vmem:[%s801_s3 + $0x28] sm:$0xff] %v578_v38   ;;  %v464_v26 = vmul.f32 %v759_v25, %v759_v25 }
  0xfd   :  { %554 = vst [vmem:[%s801_s3] sm:$0xff] %v553_v39   ;;  %v470_v44 = vadd.f32 %v469_v41, %v455_v36  ;;  %v635_v45 = vpop.f32.mrb[4].mxu0  ;;  %v434_v46 = vadd.f32 %v632_v23, %v433_v40  ;;  %593 = vst [vmem:[%s801_s3 + $0x20] sm:$0xff] %v573_v42   ;;  %v643_v47 = vpop.f32.mrb[4].mxu1 }
  0xfe   :  { %v231_v48 = vpop.f32.mrb[5].mxu0  ;;  %v263_v49 = vpop.f32.mrb[5].mxu1  ;;  %v342_v50 = vadd.f32 %v635_v45, %v517_v16  ;;  %v350_v59 = vadd.f32 %v643_v47, %v517_v16  ;;  %v459_v5 = vmul.f32 %v635_v45, %v635_v45  ;;  %v467_v35 = vmul.f32 %v643_v47, %v643_v47 }
  0xff   :  { %v435_v51 = vadd.f32 %v434_v46, %v231_v48  ;;  %v457_v52 = vmul.f32 %v231_v48, %v231_v48  ;;  %v471_v53 = vadd.f32 %v470_v44, %v456_v43  ;;  %v636_v54 = vpop.f32.mrb[6].mxu0  ;;  %v644_v55 = vpop.f32.mrb[6].mxu1  ;;  %v340_v56 = vadd.f32 %v517_v16, %v231_v48 }
 0x100   :  { %v343_v57 = vadd.f32 %v636_v54, %v517_v16  ;;  %v234_v58 = vpop.f32.mrb[7].mxu0  ;;  %v348_v60 = vadd.f32 %v517_v16, %v263_v49  ;;  %v266_v61 = vpop.f32.mrb[7].mxu1  ;;  %v351_v3 = vadd.f32 %v644_v55, %v517_v16  ;;  %v460_v11 = vmul.f32 %v636_v54, %v636_v54 }
 0x101   :  { %v472_v62 = vadd.f32 %v471_v53, %v457_v52  ;;  %v341_v63 = vadd.f32 %v517_v16, %v234_v58  ;;  %v436_v0 = vadd.f32 %v435_v51, %v234_v58  ;;  %v458_v1 = vmul.f32 %v234_v58, %v234_v58 }
 0x102   :  { %v568_v2 = vpack.c.bf16 %v343_v57, %v342_v50  ;;  %v349_v4 = vadd.f32 %v517_v16, %v266_v61  ;;  %v588_v9 = vpack.c.bf16 %v351_v3, %v350_v59  ;;  %v465_v29 = vmul.f32 %v263_v49, %v263_v49 }
 0x103   :  { %v563_v6 = vpack.c.bf16 %v341_v63, %v340_v56  ;;  %v437_v7 = vadd.f32 %v635_v45, %v436_v0  ;;  %v473_v8 = vadd.f32 %v472_v62, %v458_v1  ;;  %v466_v34 = vmul.f32 %v266_v61, %v266_v61 }
 0x104   :  { %592 = vst [vmem:[%s801_s3 + $0x18] sm:$0xff] %v568_v2   ;;  %v583_v10 = vpack.c.bf16 %v349_v4, %v348_v60  ;;  %596 = vst [vmem:[%s801_s3 + $0x38] sm:$0xff] %v588_v9   ;;  %v468_v37 = vmul.f32 %v644_v55, %v644_v55 }
 0x105   :  { %591 = vst [vmem:[%s801_s3 + $0x10] sm:$0xff] %v563_v6   ;;  %v474_v12 = vadd.f32 %v473_v8, %v459_v5  ;;  %v438_v13 = vadd.f32 %v636_v54, %v437_v7 }
 0x106   :  { %595 = vst [vmem:[%s801_s3 + $0x30] sm:$0xff] %v583_v10  }
 0x107   :  { %v439_v15 = vadd.f32 %v438_v13, %v756_v21  ;;  %v475_v16 = vadd.f32 %v474_v12, %v460_v11 }
 0x109   :  { %v476_v17 = vadd.f32 %v475_v16, %v461_v14  ;;  %v440_v19 = vadd.f32 %v439_v15, %v250_v31 }
 0x10b   :  { %v441_v23 = vadd.f32 %v753_v18, %v440_v19  ;;  %v477_v24 = vadd.f32 %v476_v17, %v462_v20 }
 0x10d   :  { %v478_v27 = vadd.f32 %v477_v24, %v463_v22  ;;  %v442_v28 = vadd.f32 %v759_v25, %v441_v23 }
 0x10f   :  { %v443_v30 = vadd.f32 %v442_v28, %v263_v49  ;;  %v479_v32 = vadd.f32 %v478_v27, %v464_v26 }
 0x111   :  { %v480_v21 = vadd.f32 %v479_v32, %v465_v29  ;;  %v444_v33 = vadd.f32 %v443_v30, %v266_v61 }
 0x113   :  { %v445_v31 = vadd.f32 %v643_v47, %v444_v33  ;;  %v481_v36 = vadd.f32 %v480_v21, %v466_v34 }
 0x115   :  { %v446_v38 = vadd.f32 %v644_v55, %v445_v31  ;;  %v482_v39 = vadd.f32 %v481_v36, %v467_v35 }
 0x117   :  { %v447_v18 = vrot.slane %v446_v38, 4  ;;  %v483_v40 = vadd.f32 %v482_v39, %v468_v37 }
 0x119   :  { %v448_v41 = vadd.f32 %v447_v18, %v446_v38  ;;  %v484_v42 = vrot.slane %v483_v40, 4 }
 0x11b   :  { %v449_v43 = vrot.slane %v448_v41, 2  ;;  %v485_v44 = vadd.f32 %v484_v42, %v483_v40 }
 0x11d   :  { %v450_v45 = vadd.f32 %v449_v43, %v448_v41  ;;  %v486_v25 = vrot.slane %v485_v44, 2 }
 0x11f   :  { %v451_v46 = vrot.slane %v450_v45, 1  ;;  %v487_v48 = vadd.f32 %v486_v25, %v485_v44 }
 0x121   :  { %v488_v49 = vrot.slane %v487_v48, 1  ;;  %v452_v50 = vadd.f32 %v451_v46, %v450_v45 }
 0x123   :  { %v489_v51 = vadd.f32 %v488_v49, %v487_v48 }
 0x125   :  { %v491_v52 = vsel %vm490_vm0, %v452_v50, %v489_v51 }
 0x126   :  { %492 = vst [vmem:[%s802_s4] sm:$0x3] %v491_v52 }

// kernel: _lambda_.8
= control target key start
LH: loop header
LB: loop body
LE: loop exit
PB: predicated region body
PF: predicated region fallthrough
CT: control target
= control target key end

     0   :  { %vm298_vm0 = vcmask 1040384   ;;  %s512_s1 = inlined_call_operand.vmem [shape: bf16[1,256,128], index: 1, kind: input, shape index: {}]   ;;  %s513_s0 = inlined_call_operand.vmem [shape: bf16[1,32,256], index: 0, kind: input, shape index: {}]   ;;  %s514_s2 = inlined_call_operand.vmem [shape: f32[1,128], index: 2, kind: input, shape index: {}]   ;;  %s515_s3 = inlined_call_operand.vmem [shape: bf16[1,32,128], index: 3, kind: output, shape index: {0}]   ;;  %s516_s4 = inlined_call_operand.vmem [shape: f32[1,8,128], index: 4, kind: output, shape index: {1}]  }
   0x1   :  { %v393_v0 = vld [vmem:[%s512_s1 + $0x40] sm:$0xff]   ;;  %v395_v2 = vld [vmem:[%s512_s1 + $0x48] sm:$0xff]   ;;  %v397_v4 = vld [vmem:[%s512_s1 + $0x50] sm:$0xff]  }
   0x2   :  { %v394_v1 = vld [vmem:[%s512_s1] sm:$0xff]   ;;  %349 = vmatprep.subr.bf16.mxu0 %v393_v0  ;;  %377 = vmatprep.subr.bf16.mxu1 %v393_v0  ;;  %v396_v3 = vld [vmem:[%s512_s1 + $0x8] sm:$0xff]   ;;  %v398_v5 = vld [vmem:[%s512_s1 + $0x10] sm:$0xff]  }
   0x3   :  { %350 = vmatpush3.bf16.msra.mxu0 %v394_v1  ;;  %385 = vmatpush3.bf16.msra.mxu1 %v394_v1  ;;  %v399_v6 = vld [vmem:[%s512_s1 + $0x58] sm:$0xff]   ;;  %v401_v8 = vld [vmem:[%s512_s1 + $0x60] sm:$0xff]   ;;  %v403_v10 = vld [vmem:[%s512_s1 + $0x68] sm:$0xff]  }
   0x4   :  { %351 = vmatprep.subr.bf16.mxu0 %v395_v2  ;;  %378 = vmatprep.subr.bf16.mxu1 %v395_v2  ;;  %v400_v7 = vld [vmem:[%s512_s1 + $0x18] sm:$0xff]   ;;  %v402_v9 = vld [vmem:[%s512_s1 + $0x20] sm:$0xff]   ;;  %v404_v13 = vld [vmem:[%s512_s1 + $0x28] sm:$0xff]  }
   0x5   :  { %v411_v11 = vld [vmem:[%s513_s0 + $0x4] ss:$8 sps:$4 sm:$0xff]   ;;  %v414_v12 = vld [vmem:[%s513_s0 + $0x14] ss:$8 sps:$4 sm:$0xff]   ;;  %v409_v18 = vld [vmem:[%s513_s0] ss:$8 sps:$4 sm:$0xff]  }
   0x6   :  { %v405_v14 = vld [vmem:[%s512_s1 + $0x70] sm:$0xff]   ;;  %213 = vmatprep.mubr.bf16.mxu0 %v411_v11  ;;  %221 = vmatprep.mubr.bf16.mxu1 %v414_v12  ;;  %v407_v16 = vld [vmem:[%s512_s1 + $0x78] sm:$0xff]   ;;  %v329_v28 = vld [vmem:[%s514_s2] ss:$0 sm:$0xff] }
   0x7   :  { %352 = vmatpush3.bf16.msra.mxu0 %v396_v3  ;;  %386 = vmatpush3.bf16.msra.mxu1 %v396_v3  ;;  %v406_v15 = vld [vmem:[%s512_s1 + $0x30] sm:$0xff]   ;;  %v408_v17 = vld [vmem:[%s512_s1 + $0x38] sm:$0xff]  }
   0x8   :  { %353 = vmatprep.subr.bf16.mxu0 %v397_v4  ;;  %379 = vmatprep.subr.bf16.mxu1 %v397_v4  ;;  %v412_v19 = vld [vmem:[%s513_s0 + $0x10] ss:$8 sps:$4 sm:$0xff]  }
   0xb   :  { %354 = vmatpush3.bf16.msra.mxu0 %v398_v5  ;;  %387 = vmatpush3.bf16.msra.mxu1 %v398_v5 }
   0xc   :  { %355 = vmatprep.subr.bf16.mxu0 %v399_v6  ;;  %380 = vmatprep.subr.bf16.mxu1 %v399_v6 }
   0xf   :  { %356 = vmatpush3.bf16.msra.mxu0 %v400_v7  ;;  %388 = vmatpush3.bf16.msra.mxu1 %v400_v7 }
  0x10   :  { %357 = vmatprep.subr.bf16.mxu0 %v401_v8  ;;  %381 = vmatprep.subr.bf16.mxu1 %v401_v8 }
  0x13   :  { %358 = vmatpush3.bf16.msra.mxu0 %v402_v9  ;;  %389 = vmatpush3.bf16.msra.mxu1 %v402_v9 }
  0x14   :  { %359 = vmatprep.subr.bf16.mxu0 %v403_v10  ;;  %382 = vmatprep.subr.bf16.mxu1 %v403_v10 }
  0x17   :  { %360 = vmatpush3.bf16.msra.mxu0 %v404_v13  ;;  %390 = vmatpush3.bf16.msra.mxu1 %v404_v13 }
  0x18   :  { %361 = vmatprep.subr.bf16.mxu0 %v405_v14  ;;  %383 = vmatprep.subr.bf16.mxu1 %v405_v14 }
  0x1b   :  { %362 = vmatpush3.bf16.msra.mxu0 %v406_v15  ;;  %391 = vmatpush3.bf16.msra.mxu1 %v406_v15 }
  0x1c   :  { %363 = vmatprep.subr.bf16.mxu0 %v407_v16  ;;  %384 = vmatprep.subr.bf16.mxu1 %v407_v16 }
  0x1f   :  { %364 = vmatpush3.bf16.msra.mxu0 %v408_v17  ;;  %392 = vmatpush3.bf16.msra.mxu1 %v408_v17 }
  0x22   :  { %214 = vmatmul.mubr.bf16.vlgmr.msra.gmra.mrb[0].mxu0 %v409_v18  ;;  %222 = vmatmul.mubr.bf16.vlgmr.msra.gmra.mrb[0].mxu1 %v412_v19 }
  0xf5   :  { %v365_v20 = vpop.f32.mrb[0].mxu0  ;;  %v371_v21 = vpop.f32.mrb[0].mxu1 }
  0xf6   :  { %v366_v22 = vpop.f32.mrb[1].mxu0  ;;  %v372_v23 = vpop.f32.mrb[1].mxu1 }
  0xf7   :  { %v367_v24 = vadd.f32 %v366_v22, %v365_v20  ;;  %v368_v25 = vpop.f32.mrb[2].mxu0  ;;  %v373_v26 = vadd.f32 %v372_v23, %v371_v21  ;;  %v374_v27 = vpop.f32.mrb[2].mxu1 }
  0xf8   :  { %v369_v29 = vpop.f32.mrb[3].mxu0  ;;  %v375_v30 = vpop.f32.mrb[3].mxu1 }
  0xf9   :  { %v254_v31 = vadd.f32 %v373_v26, %v329_v28  ;;  %v370_v32 = vadd.f32 %v369_v29, %v368_v25  ;;  %v376_v33 = vadd.f32 %v375_v30, %v374_v27  ;;  %v252_v34 = vadd.f32 %v367_v24, %v329_v28 }
  0xfa   :  { %v285_v35 = vmul.f32 %v367_v24, %v367_v24  ;;  %v287_v36 = vmul.f32 %v373_v26, %v373_v26 }
  0xfb   :  { %v253_v37 = vadd.f32 %v370_v32, %v329_v28  ;;  %v276_v38 = vadd.f32 %v370_v32, %v367_v24  ;;  %v286_v39 = vmul.f32 %v370_v32, %v370_v32  ;;  %v255_v40 = vadd.f32 %v376_v33, %v329_v28 }
  0xfc   :  { %v288_v46 = vmul.f32 %v376_v33, %v376_v33 }
  0xfd   :  { %v341_v41 = vpack.c.bf16 %v253_v37, %v252_v34  ;;  %v289_v42 = vadd.f32 %v286_v39, %v285_v35  ;;  %v346_v43 = vpack.c.bf16 %v255_v40, %v254_v31  ;;  %v277_v44 = vadd.f32 %v373_v26, %v276_v38 }
  0xff   :  { %342 = vst [vmem:[%s515_s3] sm:$0xff] %v341_v41   ;;  %348 = vst [vmem:[%s515_s3 + $0x8] sm:$0xff] %v346_v43   ;;  %v278_v45 = vadd.f32 %v376_v33, %v277_v44  ;;  %v290_v47 = vadd.f32 %v289_v42, %v287_v36 }
 0x101   :  { %v279_v48 = vrot.slane %v278_v45, 4  ;;  %v291_v49 = vadd.f32 %v290_v47, %v288_v46 }
 0x103   :  { %v280_v50 = vadd.f32 %v279_v48, %v278_v45  ;;  %v292_v51 = vrot.slane %v291_v49, 4 }
 0x105   :  { %v281_v52 = vrot.slane %v280_v50, 2  ;;  %v293_v53 = vadd.f32 %v292_v51, %v291_v49 }
 0x107   :  { %v282_v54 = vadd.f32 %v281_v52, %v280_v50  ;;  %v294_v55 = vrot.slane %v293_v53, 2 }
 0x109   :  { %v283_v56 = vrot.slane %v282_v54, 1  ;;  %v295_v57 = vadd.f32 %v294_v55, %v293_v53 }
 0x10b   :  { %v296_v58 = vrot.slane %v295_v57, 1  ;;  %v284_v59 = vadd.f32 %v283_v56, %v282_v54 }
 0x10d   :  { %v297_v60 = vadd.f32 %v296_v58, %v295_v57 }
 0x10f   :  { %v299_v61 = vsel %vm298_vm0, %v284_v59, %v297_v60 }
 0x110   :  { %300 = vst [vmem:[%s516_s4] sm:$0x3] %v299_v61 }

// kernel: _lambda_.9
= control target key start
LH: loop header
LB: loop body
LE: loop exit
PB: predicated region body
PF: predicated region fallthrough
CT: control target
= control target key end

     0   :  { %s1041_s15 = smov 0   ;;  %s1043_s16 = smov 0   ;;  %s1107_s0 = inlined_call_operand.vmem [shape: bf16[4,32,256], index: 0, kind: input, shape index: {}]   ;;  %s1108_s1 = inlined_call_operand.vmem [shape: bf16[4,256,128], index: 1, kind: input, shape index: {}]   ;;  %s1109_s2 = inlined_call_operand.vmem [shape: f32[1,128], index: 2, kind: input, shape index: {}]   ;;  %s1110_s3 = inlined_call_operand.vmem [shape: bf16[4,32,128], index: 3, kind: output, shape index: {0}]   ;;  %s1111_s4 = inlined_call_operand.vmem [shape: f32[4,8,128], index: 4, kind: output, shape index: {1}]  }
   0x1   :  { %s1045_s17 = smov 0  }
   0x2 LB: > { %s41_s18 = sadd.s32 1, %s1010_s16  ;;  %p849_p0 = scmp.ge.s32.totalorder %s1014_s17, 1  ;;  %s1014_s17 = sphi %s1045_s17, %s15_s17   ;;  %s1010_s16 = sphi %s1043_s16, %s1113_s16   ;;  %s1006_s15 = sphi %s1041_s15, %s1112_s15  }
   0x3   : > { %p43_p1 = scmp.ge.s32.totalorder %s41_s18, 4  ;;  %p244_p2 = scmp.lt.s32.totalorder %s1014_s17, 5 }
   0x5   : > { %s1115_s18 = smov (%p43_p1, %s41_s18), 0  ;;  %p245_p3 = pnand %p849_p0, %p244_p2 }
   0x6   : > { %p313_p4 = scmp.lt.s32.totalorder (!%p245_p3), %s1006_s15, 3  ;;  %v877_v28 = vld [vmem:[%s1109_s2] ss:$0 sm:$0xff] (!%p245_p3)  ;;  %vm648_vm0 = vcmask (!%p245_p3), 1040384  }
   0x7   : > { %248 = sbr.rel (%p245_p3) target bundleno = 289 (0x121), region = 32 }
   0xe   : > { %s1117_s15 = smov (!%p313_p4, %s1006_s15), 3 }
   0xf   : > { %s885_s19 = sshll.u32 %s1117_s15, 7  ;;  %s884_s23 = sshll.u32 %s1117_s15, 5 }
  0x10   : > { %s1065_s22 = scalar_lea.vmem %s1108_s1, %s885_s19  ;;  %s324_s26 = scalar_lea.vmem %s1107_s0, %s884_s23 }
  0x11   : > { %v970_v0 = vld [vmem:[%s1065_s22 + $0x40] sm:$0xff]   ;;  %v972_v2 = vld [vmem:[%s1065_s22 + $0x48] sm:$0xff]   ;;  %v974_v4 = vld [vmem:[%s1065_s22 + $0x50] sm:$0xff]   ;;  %s886_s29 = sshll.u32 %s1117_s15, 4  ;;  %s856_s7 = sshll.u32 %s1117_s15, 3 }
  0x12   : > { %v971_v1 = vld [vmem:[%s1065_s22] sm:$0xff]   ;;  %902 = vmatprep.subr.bf16.mxu0 %v970_v0  ;;  %930 = vmatprep.subr.bf16.mxu1 %v970_v0  ;;  %v973_v3 = vld [vmem:[%s1065_s22 + $0x8] sm:$0xff]   ;;  %v975_v5 = vld [vmem:[%s1065_s22 + $0x10] sm:$0xff]   ;;  %s354_s6 = scalar_lea.vmem %s1110_s3, %s886_s29  ;;  %s365_s10 = scalar_lea.vmem %s1111_s4, %s856_s7 }
  0x13   : > { %903 = vmatpush3.bf16.msra.mxu0 %v971_v1  ;;  %938 = vmatpush3.bf16.msra.mxu1 %v971_v1  ;;  %v976_v6 = vld [vmem:[%s1065_s22 + $0x58] sm:$0xff]   ;;  %v978_v8 = vld [vmem:[%s1065_s22 + $0x60] sm:$0xff]   ;;  %v980_v10 = vld [vmem:[%s1065_s22 + $0x68] sm:$0xff]  }
  0x14   : > { %904 = vmatprep.subr.bf16.mxu0 %v972_v2  ;;  %931 = vmatprep.subr.bf16.mxu1 %v972_v2  ;;  %v977_v7 = vld [vmem:[%s1065_s22 + $0x18] sm:$0xff]   ;;  %v979_v9 = vld [vmem:[%s1065_s22 + $0x20] sm:$0xff]   ;;  %v981_v13 = vld [vmem:[%s1065_s22 + $0x28] sm:$0xff]  }
  0x15   : > { %v988_v11 = vld [vmem:[%s324_s26 + $0x4] ss:$8 sps:$4 sm:$0xff]   ;;  %v991_v12 = vld [vmem:[%s324_s26 + $0x14] ss:$8 sps:$4 sm:$0xff]   ;;  %v986_v18 = vld [vmem:[%s324_s26] ss:$8 sps:$4 sm:$0xff]  }
  0x16   : > { %v982_v14 = vld [vmem:[%s1065_s22 + $0x70] sm:$0xff]   ;;  %563 = vmatprep.mubr.bf16.mxu0 %v988_v11  ;;  %571 = vmatprep.mubr.bf16.mxu1 %v991_v12  ;;  %v984_v16 = vld [vmem:[%s1065_s22 + $0x78] sm:$0xff]  }
  0x17   : > { %905 = vmatpush3.bf16.msra.mxu0 %v973_v3  ;;  %939 = vmatpush3.bf16.msra.mxu1 %v973_v3  ;;  %v983_v15 = vld [vmem:[%s1065_s22 + $0x30] sm:$0xff]   ;;  %v985_v17 = vld [vmem:[%s1065_s22 + $0x38] sm:$0xff]  }
  0x18   : > { %906 = vmatprep.subr.bf16.mxu0 %v974_v4  ;;  %932 = vmatprep.subr.bf16.mxu1 %v974_v4  ;;  %v989_v19 = vld [vmem:[%s324_s26 + $0x10] ss:$8 sps:$4 sm:$0xff]  }
  0x1b   : > { %907 = vmatpush3.bf16.msra.mxu0 %v975_v5  ;;  %940 = vmatpush3.bf16.msra.mxu1 %v975_v5 }
  0x1c   : > { %908 = vmatprep.subr.bf16.mxu0 %v976_v6  ;;  %933 = vmatprep.subr.bf16.mxu1 %v976_v6 }
  0x1f   : > { %909 = vmatpush3.bf16.msra.mxu0 %v977_v7  ;;  %941 = vmatpush3.bf16.msra.mxu1 %v977_v7 }
  0x20   : > { %910 = vmatprep.subr.bf16.mxu0 %v978_v8  ;;  %934 = vmatprep.subr.bf16.mxu1 %v978_v8 }
  0x23   : > { %911 = vmatpush3.bf16.msra.mxu0 %v979_v9  ;;  %942 = vmatpush3.bf16.msra.mxu1 %v979_v9 }
  0x24   : > { %912 = vmatprep.subr.bf16.mxu0 %v980_v10  ;;  %935 = vmatprep.subr.bf16.mxu1 %v980_v10 }
  0x27   : > { %913 = vmatpush3.bf16.msra.mxu0 %v981_v13  ;;  %943 = vmatpush3.bf16.msra.mxu1 %v981_v13 }
  0x28   : > { %914 = vmatprep.subr.bf16.mxu0 %v982_v14  ;;  %936 = vmatprep.subr.bf16.mxu1 %v982_v14 }
  0x2b   : > { %915 = vmatpush3.bf16.msra.mxu0 %v983_v15  ;;  %944 = vmatpush3.bf16.msra.mxu1 %v983_v15 }
  0x2c   : > { %916 = vmatprep.subr.bf16.mxu0 %v984_v16  ;;  %937 = vmatprep.subr.bf16.mxu1 %v984_v16 }
  0x2f   : > { %917 = vmatpush3.bf16.msra.mxu0 %v985_v17  ;;  %945 = vmatpush3.bf16.msra.mxu1 %v985_v17 }
  0x32   : > { %564 = vmatmul.mubr.bf16.vlgmr.msra.gmra.mrb[0].mxu0 %v986_v18  ;;  %572 = vmatmul.mubr.bf16.vlgmr.msra.gmra.mrb[0].mxu1 %v989_v19 }
 0x105   : > { %v918_v20 = vpop.f32.mrb[0].mxu0  ;;  %v924_v21 = vpop.f32.mrb[0].mxu1 }
 0x106   : > { %v919_v22 = vpop.f32.mrb[1].mxu0  ;;  %v925_v23 = vpop.f32.mrb[1].mxu1 }
 0x107   : > { %v920_v24 = vadd.f32 %v919_v22, %v918_v20  ;;  %v921_v25 = vpop.f32.mrb[2].mxu0  ;;  %v926_v26 = vadd.f32 %v925_v23, %v924_v21  ;;  %v927_v27 = vpop.f32.mrb[2].mxu1 }
 0x108   : > { %v922_v29 = vpop.f32.mrb[3].mxu0  ;;  %v928_v30 = vpop.f32.mrb[3].mxu1 }
 0x109   : > { %v604_v31 = vadd.f32 %v926_v26, %v877_v28  ;;  %v923_v32 = vadd.f32 %v922_v29, %v921_v25  ;;  %v929_v33 = vadd.f32 %v928_v30, %v927_v27  ;;  %v602_v34 = vadd.f32 %v920_v24, %v877_v28 }
 0x10a   : > { %v635_v35 = vmul.f32 %v920_v24, %v920_v24  ;;  %v637_v36 = vmul.f32 %v926_v26, %v926_v26 }
 0x10b   : > { %v603_v37 = vadd.f32 %v923_v32, %v877_v28  ;;  %v626_v38 = vadd.f32 %v923_v32, %v920_v24  ;;  %v636_v39 = vmul.f32 %v923_v32, %v923_v32  ;;  %v605_v40 = vadd.f32 %v929_v33, %v877_v28 }
 0x10c   : > { %v638_v46 = vmul.f32 %v929_v33, %v929_v33 }
 0x10d   : > { %v894_v41 = vpack.c.bf16 %v603_v37, %v602_v34  ;;  %v639_v42 = vadd.f32 %v636_v39, %v635_v35  ;;  %v899_v43 = vpack.c.bf16 %v605_v40, %v604_v31  ;;  %v627_v44 = vadd.f32 %v926_v26, %v626_v38 }
 0x10f   : > { %895 = vst [vmem:[%s354_s6] sm:$0xff] %v894_v41   ;;  %901 = vst [vmem:[%s354_s6 + $0x8] sm:$0xff] %v899_v43   ;;  %v628_v45 = vadd.f32 %v929_v33, %v627_v44  ;;  %v640_v47 = vadd.f32 %v639_v42, %v637_v36 }
 0x111   : > { %v629_v48 = vrot.slane %v628_v45, 4  ;;  %v641_v49 = vadd.f32 %v640_v47, %v638_v46 }
 0x113   : > { %v630_v50 = vadd.f32 %v629_v48, %v628_v45  ;;  %v642_v51 = vrot.slane %v641_v49, 4 }
 0x115   : > { %v631_v52 = vrot.slane %v630_v50, 2  ;;  %v643_v53 = vadd.f32 %v642_v51, %v641_v49 }
 0x117   : > { %v632_v54 = vadd.f32 %v631_v52, %v630_v50  ;;  %v644_v55 = vrot.slane %v643_v53, 2 }
 0x119   : > { %v633_v56 = vrot.slane %v632_v54, 1  ;;  %v645_v57 = vadd.f32 %v644_v55, %v643_v53 }
 0x11b   : > { %v646_v58 = vrot.slane %v645_v57, 1  ;;  %v634_v59 = vadd.f32 %v633_v56, %v632_v54 }
 0x11d   : > { %v647_v60 = vadd.f32 %v646_v58, %v645_v57 }
 0x11f   : > { %v649_v61 = vsel %vm648_vm0, %v634_v59, %v647_v60 }
 0x120   : > { %650 = vst [vmem:[%s365_s10] sm:$0x3] %v649_v61 }
 0x121 PF: > { %s15_s17 = sadd.s32 1, %s1014_s17   ;;  %s1112_s15 = smov %s1010_s16 }
 0x122   : > { %p12_p5 = scmp.ge.s32.totalorder %s15_s17, 6   ;;  %s1113_s16 = smov %s1115_s18 }
 0x124   :  { %14 = sbr.rel (!%p12_p5) target bundleno = 2 (0x2), region = 88 }

// kernel: _lambda_.10
= control target key start
LH: loop header
LB: loop body
LE: loop exit
PB: predicated region body
PF: predicated region fallthrough
CT: control target
= control target key end

     0   :  { %s1292_s15 = smov 0   ;;  %s1294_s16 = smov 0   ;;  %s1391_s0 = inlined_call_operand.vmem [shape: bf16[4,128,128], index: 0, kind: input, shape index: {}]   ;;  %s1392_s1 = inlined_call_operand.vmem [shape: bf16[4,128,128], index: 1, kind: input, shape index: {}]   ;;  %s1393_s2 = inlined_call_operand.vmem [shape: f32[1,128], index: 2, kind: input, shape index: {}]   ;;  %s1394_s3 = inlined_call_operand.vmem [shape: bf16[4,128,128], index: 3, kind: output, shape index: {0}]   ;;  %s1395_s4 = inlined_call_operand.vmem [shape: f32[4,8,128], index: 4, kind: output, shape index: {1}]  }
   0x1   :  { %s1296_s17 = smov 0  }
   0x2 LB: > { %s41_s18 = sadd.s32 1, %s1261_s16  ;;  %p1030_p0 = scmp.ge.s32.totalorder %s1265_s17, 1  ;;  %s1265_s17 = sphi %s1296_s17, %s15_s17   ;;  %s1261_s16 = sphi %s1294_s16, %s1397_s16   ;;  %s1257_s15 = sphi %s1292_s15, %s1396_s15  }
   0x3   : > { %p43_p1 = scmp.ge.s32.totalorder %s41_s18, 4  ;;  %p241_p2 = scmp.lt.s32.totalorder %s1265_s17, 5 }
   0x5   : > { %s1399_s18 = smov (%p43_p1, %s41_s18), 0  ;;  %p242_p3 = pnand %p1030_p0, %p241_p2 }
   0x6   : > { %p307_p4 = scmp.lt.s32.totalorder (!%p242_p3), %s1257_s15, 3  ;;  %v1054_v16 = vld [vmem:[%s1393_s2] ss:$0 sm:$0xff] (!%p242_p3)  ;;  %vm832_vm0 = vcmask (!%p242_p3), 1040384  }
   0x7   : > { %245 = sbr.rel (%p242_p3) target bundleno = 311 (0x137), region = 32 }
   0xe   : > { %s1401_s15 = smov (!%p307_p4, %s1257_s15), 3 }
   0xf   : > { %s1313_s19 = sshll.u32 %s1401_s15, 6  ;;  %s1037_s5 = sshll.u32 %s1401_s15, 3 }
  0x10   : > { %s1319_s22 = scalar_lea.vmem %s1392_s1, %s1313_s19  ;;  %s1328_s25 = scalar_lea.vmem %s1391_s0, %s1313_s19 }
  0x11   : > { %v1227_v0 = vld [vmem:[%s1319_s22] sm:$0xff]   ;;  %v1228_v1 = vld [vmem:[%s1319_s22 + $0x8] sm:$0xff]   ;;  %v1229_v2 = vld [vmem:[%s1319_s22 + $0x10] sm:$0xff]   ;;  %s1359_s30 = scalar_lea.vmem %s1394_s3, %s1313_s19  ;;  %s357_s8 = scalar_lea.vmem %s1395_s4, %s1037_s5 }
  0x12   : > { %1155 = vmatprep.subr.bf16.mxu0 %v1227_v0  ;;  %1187 = vmatprep.subr.bf16.mxu1 %v1227_v0  ;;  %v1230_v3 = vld [vmem:[%s1319_s22 + $0x18] sm:$0xff]   ;;  %v1235_v4 = vld [vmem:[%s1328_s25] sm:$0xff]   ;;  %v1232_v7 = vld [vmem:[%s1319_s22 + $0x28] sm:$0xff]  }
  0x13   : > { %1156 = vmatpush3.bf16.msra.mxu0 %v1227_v0  ;;  %1195 = vmatpush3.bf16.msra.mxu1 %v1227_v0  ;;  %v1231_v5 = vld [vmem:[%s1319_s22 + $0x20] sm:$0xff]   ;;  %v1233_v8 = vld [vmem:[%s1319_s22 + $0x30] sm:$0xff]   ;;  %v1234_v9 = vld [vmem:[%s1319_s22 + $0x38] sm:$0xff]  }
  0x14   : > { %1157 = vmatprep.subr.bf16.mxu0 %v1228_v1  ;;  %1188 = vmatprep.subr.bf16.mxu1 %v1228_v1  ;;  %v1239_v6 = vld [vmem:[%s1328_s25 + $0x20] sm:$0xff]   ;;  %v1236_v10 = vld [vmem:[%s1328_s25 + $0x8] sm:$0xff]   ;;  %v1237_v12 = vld [vmem:[%s1328_s25 + $0x10] sm:$0xff]  }
  0x15   : > { %1171 = vmatprep.mubr.bf16.mxu0 %v1235_v4  ;;  %1179 = vmatprep.mubr.bf16.mxu1 %v1239_v6  ;;  %v1240_v11 = vld [vmem:[%s1328_s25 + $0x28] sm:$0xff]   ;;  %v1241_v13 = vld [vmem:[%s1328_s25 + $0x30] sm:$0xff]   ;;  %v1238_v14 = vld [vmem:[%s1328_s25 + $0x18] sm:$0xff]  }
  0x16   : > { %v1242_v15 = vld [vmem:[%s1328_s25 + $0x38] sm:$0xff]  }
  0x17   : > { %1158 = vmatpush3.bf16.msra.mxu0 %v1228_v1  ;;  %1196 = vmatpush3.bf16.msra.mxu1 %v1228_v1 }
  0x18   : > { %1159 = vmatprep.subr.bf16.mxu0 %v1229_v2  ;;  %1189 = vmatprep.subr.bf16.mxu1 %v1229_v2 }
  0x1b   : > { %1160 = vmatpush3.bf16.msra.mxu0 %v1229_v2  ;;  %1197 = vmatpush3.bf16.msra.mxu1 %v1229_v2 }
  0x1c   : > { %1161 = vmatprep.subr.bf16.mxu0 %v1230_v3  ;;  %1190 = vmatprep.subr.bf16.mxu1 %v1230_v3 }
  0x1f   : > { %1162 = vmatpush3.bf16.msra.mxu0 %v1230_v3  ;;  %1198 = vmatpush3.bf16.msra.mxu1 %v1230_v3 }
  0x20   : > { %1163 = vmatprep.subr.bf16.mxu0 %v1231_v5  ;;  %1191 = vmatprep.subr.bf16.mxu1 %v1231_v5 }
  0x23   : > { %1164 = vmatpush3.bf16.msra.mxu0 %v1231_v5  ;;  %1199 = vmatpush3.bf16.msra.mxu1 %v1231_v5 }
  0x24   : > { %1165 = vmatprep.subr.bf16.mxu0 %v1232_v7  ;;  %1192 = vmatprep.subr.bf16.mxu1 %v1232_v7 }
  0x27   : > { %1166 = vmatpush3.bf16.msra.mxu0 %v1232_v7  ;;  %1200 = vmatpush3.bf16.msra.mxu1 %v1232_v7 }
  0x28   : > { %1167 = vmatprep.subr.bf16.mxu0 %v1233_v8  ;;  %1193 = vmatprep.subr.bf16.mxu1 %v1233_v8 }
  0x2b   : > { %1168 = vmatpush3.bf16.msra.mxu0 %v1233_v8  ;;  %1201 = vmatpush3.bf16.msra.mxu1 %v1233_v8 }
  0x2c   : > { %1169 = vmatprep.subr.bf16.mxu0 %v1234_v9  ;;  %1194 = vmatprep.subr.bf16.mxu1 %v1234_v9 }
  0x2f   : > { %1170 = vmatpush3.bf16.msra.mxu0 %v1234_v9  ;;  %1202 = vmatpush3.bf16.msra.mxu1 %v1234_v9 }
  0x32   : > { %1172 = vmatmul.mubr.bf16.vlgmr.msra.gmra.mrb[0].mxu0 %v1236_v10  ;;  %1180 = vmatmul.mubr.bf16.vlgmr.msra.gmra.mrb[0].mxu1 %v1240_v11 }
  0x33   : > { %1175 = vmatprep.mubr.bf16.mxu0 %v1237_v12  ;;  %1183 = vmatprep.mubr.bf16.mxu1 %v1241_v13 }
  0x3a   : > { %1176 = vmatmul.mubr.bf16.gmra.mrb[4].mxu0 %v1238_v14  ;;  %1184 = vmatmul.mubr.bf16.gmra.mrb[4].mxu1 %v1242_v15 }
 0x105   : > { %v1173_v17 = vpop.f32.mrb[0].mxu0  ;;  %v1346_v18 = vpop.f32.mrb[0].mxu1 }
 0x106   : > { %v557_v19 = vpop.f32.mrb[1].mxu0  ;;  %v688_v20 = vadd.f32 %v1346_v18, %v1054_v16  ;;  %v1349_v21 = vpop.f32.mrb[1].mxu1  ;;  %v680_v22 = vadd.f32 %v1173_v17, %v1054_v16  ;;  %v797_v36 = vmul.f32 %v1173_v17, %v1173_v17 }
 0x107   : > { %v1174_v23 = vpop.f32.mrb[2].mxu0  ;;  %v686_v24 = vadd.f32 %v1054_v16, %v1349_v21  ;;  %v1352_v25 = vpop.f32.mrb[2].mxu1  ;;  %v678_v26 = vadd.f32 %v1054_v16, %v557_v19  ;;  %v795_v27 = vmul.f32 %v557_v19, %v557_v19  ;;  %v803_v14 = vmul.f32 %v1349_v21, %v1349_v21 }
 0x108   : > { %v681_v28 = vadd.f32 %v1174_v23, %v1054_v16  ;;  %v560_v29 = vpop.f32.mrb[3].mxu0  ;;  %v689_v30 = vadd.f32 %v1352_v25, %v1054_v16  ;;  %v592_v31 = vpop.f32.mrb[3].mxu1  ;;  %v798_v43 = vmul.f32 %v1174_v23, %v1174_v23 }
 0x109   : > { %v679_v32 = vadd.f32 %v1054_v16, %v560_v29  ;;  %v774_v33 = vadd.f32 %v560_v29, %v557_v19  ;;  %v796_v34 = vmul.f32 %v560_v29, %v560_v29  ;;  %v687_v35 = vadd.f32 %v1054_v16, %v592_v31 }
 0x10a   : > { %v1100_v37 = vpack.c.bf16 %v681_v28, %v680_v22  ;;  %v1120_v38 = vpack.c.bf16 %v689_v30, %v688_v20  ;;  %v804_v20 = vmul.f32 %v592_v31, %v592_v31  ;;  %v805_v22 = vmul.f32 %v1346_v18, %v1346_v18 }
 0x10b   : > { %v1095_v39 = vpack.c.bf16 %v679_v32, %v678_v26  ;;  %v775_v40 = vadd.f32 %v1173_v17, %v774_v33  ;;  %v811_v41 = vadd.f32 %v796_v34, %v795_v27  ;;  %v1115_v42 = vpack.c.bf16 %v687_v35, %v686_v24 }
 0x10c   : > { %1132 = vst [vmem:[%s1359_s30 + $0x8] sm:$0xff] %v1100_v37   ;;  %1136 = vst [vmem:[%s1359_s30 + $0x28] sm:$0xff] %v1120_v38   ;;  %v806_v26 = vmul.f32 %v1352_v25, %v1352_v25 }
 0x10d   : > { %1096 = vst [vmem:[%s1359_s30] sm:$0xff] %v1095_v39   ;;  %v812_v44 = vadd.f32 %v811_v41, %v797_v36  ;;  %v1177_v45 = vpop.f32.mrb[4].mxu0  ;;  %v776_v46 = vadd.f32 %v1174_v23, %v775_v40  ;;  %1135 = vst [vmem:[%s1359_s30 + $0x20] sm:$0xff] %v1115_v42   ;;  %v1185_v47 = vpop.f32.mrb[4].mxu1 }
 0x10e   : > { %v573_v48 = vpop.f32.mrb[5].mxu0  ;;  %v605_v49 = vpop.f32.mrb[5].mxu1  ;;  %v684_v50 = vadd.f32 %v1177_v45, %v1054_v16  ;;  %v692_v59 = vadd.f32 %v1185_v47, %v1054_v16  ;;  %v801_v5 = vmul.f32 %v1177_v45, %v1177_v45  ;;  %v809_v35 = vmul.f32 %v1185_v47, %v1185_v47 }
 0x10f   : > { %v777_v51 = vadd.f32 %v776_v46, %v573_v48  ;;  %v799_v52 = vmul.f32 %v573_v48, %v573_v48  ;;  %v813_v53 = vadd.f32 %v812_v44, %v798_v43  ;;  %v1178_v54 = vpop.f32.mrb[6].mxu0  ;;  %v1186_v55 = vpop.f32.mrb[6].mxu1  ;;  %v682_v56 = vadd.f32 %v1054_v16, %v573_v48 }
 0x110   : > { %v685_v57 = vadd.f32 %v1178_v54, %v1054_v16  ;;  %v576_v58 = vpop.f32.mrb[7].mxu0  ;;  %v690_v60 = vadd.f32 %v1054_v16, %v605_v49  ;;  %v608_v61 = vpop.f32.mrb[7].mxu1  ;;  %v693_v3 = vadd.f32 %v1186_v55, %v1054_v16  ;;  %v802_v11 = vmul.f32 %v1178_v54, %v1178_v54 }
 0x111   : > { %v814_v62 = vadd.f32 %v813_v53, %v799_v52  ;;  %v683_v63 = vadd.f32 %v1054_v16, %v576_v58  ;;  %v778_v0 = vadd.f32 %v777_v51, %v576_v58  ;;  %v800_v1 = vmul.f32 %v576_v58, %v576_v58 }
 0x112   : > { %v1110_v2 = vpack.c.bf16 %v685_v57, %v684_v50  ;;  %v691_v4 = vadd.f32 %v1054_v16, %v608_v61  ;;  %v1130_v9 = vpack.c.bf16 %v693_v3, %v692_v59  ;;  %v807_v29 = vmul.f32 %v605_v49, %v605_v49 }
 0x113   : > { %v1105_v6 = vpack.c.bf16 %v683_v63, %v682_v56  ;;  %v779_v7 = vadd.f32 %v1177_v45, %v778_v0  ;;  %v815_v8 = vadd.f32 %v814_v62, %v800_v1  ;;  %v808_v34 = vmul.f32 %v608_v61, %v608_v61 }
 0x114   : > { %1134 = vst [vmem:[%s1359_s30 + $0x18] sm:$0xff] %v1110_v2   ;;  %v1125_v10 = vpack.c.bf16 %v691_v4, %v690_v60  ;;  %1138 = vst [vmem:[%s1359_s30 + $0x38] sm:$0xff] %v1130_v9   ;;  %v810_v37 = vmul.f32 %v1186_v55, %v1186_v55 }
 0x115   : > { %1133 = vst [vmem:[%s1359_s30 + $0x10] sm:$0xff] %v1105_v6   ;;  %v816_v12 = vadd.f32 %v815_v8, %v801_v5  ;;  %v780_v13 = vadd.f32 %v1178_v54, %v779_v7 }
 0x116   : > { %1137 = vst [vmem:[%s1359_s30 + $0x30] sm:$0xff] %v1125_v10  }
 0x117   : > { %v781_v15 = vadd.f32 %v780_v13, %v1349_v21  ;;  %v817_v17 = vadd.f32 %v816_v12, %v802_v11 }
 0x119   : > { %v818_v16 = vadd.f32 %v817_v17, %v803_v14  ;;  %v782_v19 = vadd.f32 %v781_v15, %v592_v31 }
 0x11b   : > { %v783_v23 = vadd.f32 %v1346_v18, %v782_v19  ;;  %v819_v24 = vadd.f32 %v818_v16, %v804_v20 }
 0x11d   : > { %v820_v27 = vadd.f32 %v819_v24, %v805_v22  ;;  %v784_v28 = vadd.f32 %v1352_v25, %v783_v23 }
 0x11f   : > { %v785_v30 = vadd.f32 %v784_v28, %v605_v49  ;;  %v821_v32 = vadd.f32 %v820_v27, %v806_v26 }
 0x121   : > { %v822_v21 = vadd.f32 %v821_v32, %v807_v29  ;;  %v786_v33 = vadd.f32 %v785_v30, %v608_v61 }
 0x123   : > { %v787_v31 = vadd.f32 %v1185_v47, %v786_v33  ;;  %v823_v36 = vadd.f32 %v822_v21, %v808_v34 }
 0x125   : > { %v788_v38 = vadd.f32 %v1186_v55, %v787_v31  ;;  %v824_v18 = vadd.f32 %v823_v36, %v809_v35 }
 0x127   : > { %v789_v39 = vrot.slane %v788_v38, 4  ;;  %v825_v40 = vadd.f32 %v824_v18, %v810_v37 }
 0x129   : > { %v790_v41 = vadd.f32 %v789_v39, %v788_v38  ;;  %v826_v42 = vrot.slane %v825_v40, 4 }
 0x12b   : > { %v791_v43 = vrot.slane %v790_v41, 2  ;;  %v827_v44 = vadd.f32 %v826_v42, %v825_v40 }
 0x12d   : > { %v792_v25 = vadd.f32 %v791_v43, %v790_v41  ;;  %v828_v45 = vrot.slane %v827_v44, 2 }
 0x12f   : > { %v793_v46 = vrot.slane %v792_v25, 1  ;;  %v829_v48 = vadd.f32 %v828_v45, %v827_v44 }
 0x131   : > { %v830_v49 = vrot.slane %v829_v48, 1  ;;  %v794_v47 = vadd.f32 %v793_v46, %v792_v25 }
 0x133   : > { %v831_v50 = vadd.f32 %v830_v49, %v829_v48 }
 0x135   : > { %v833_v51 = vsel %vm832_vm0, %v794_v47, %v831_v50 }
 0x136   : > { %834 = vst [vmem:[%s357_s8] sm:$0x3] %v833_v51 }
 0x137 PF: > { %s15_s17 = sadd.s32 1, %s1265_s17   ;;  %s1396_s15 = smov %s1261_s16 }
 0x138   : > { %p12_p5 = scmp.ge.s32.totalorder %s15_s17, 6   ;;  %s1397_s16 = smov %s1399_s18 }
 0x13a   :  { %14 = sbr.rel (!%p12_p5) target bundleno = 2 (0x2), region = 88 }

// kernel: _lambda_.11
= control target key start
LH: loop header
LB: loop body
LE: loop exit
PB: predicated region body
PF: predicated region fallthrough
CT: control target
= control target key end

     0   :  { %s2009_s12 = smov 0   ;;  %s2011_s13 = smov 0   ;;  %s2229_s0 = inlined_call_operand.vmem [shape: bf16[4,512,128], index: 0, kind: input, shape index: {}]   ;;  %s2230_s1 = inlined_call_operand.vmem [shape: bf16[4,128,128], index: 1, kind: input, shape index: {}]   ;;  %s2231_s2 = inlined_call_operand.vmem [shape: f32[1,128], index: 2, kind: input, shape index: {}]   ;;  %s2232_s3 = inlined_call_operand.vmem [shape: f32[4,512,128], index: 3, kind: output, shape index: {}]  }
   0x1   :  { %s2013_s14 = smov 0  }
   0x2 LB: > { %s39_s15 = sadd.s32 1, %s1983_s13  ;;  %p1584_p0 = scmp.ge.s32.totalorder %s1987_s14, 1  ;;  %s1987_s14 = sphi %s2013_s14, %s13_s14   ;;  %s1983_s13 = sphi %s2011_s13, %s2234_s13   ;;  %s1979_s12 = sphi %s2009_s12, %s2233_s12  }
   0x3   : > { %p41_p1 = scmp.ge.s32.totalorder %s39_s15, 4  ;;  %p209_p2 = scmp.lt.s32.totalorder %s1987_s14, 5 }
   0x5   : > { %s2236_s15 = smov (%p41_p1, %s39_s15), 0  ;;  %p210_p3 = pnand %p1584_p0, %p209_p2 }
   0x6   : > { %p263_p4 = scmp.lt.s32.totalorder (!%p210_p3), %s1979_s12, 3  ;;  %v2084_v40 = vld [vmem:[%s2231_s2] ss:$0 sm:$0xff] (!%p210_p3) }
   0x7   : > { %213 = sbr.rel (%p210_p3) target bundleno = 342 (0x156), region = 32 }
   0xe   : > { %s2238_s12 = smov (!%p263_p4, %s1979_s12), 3 }
   0xf   : > { %s1635_s16 = sshll.u32 %s2238_s12, 6  ;;  %s1634_s20 = sshll.u32 %s2238_s12, 8 }
  0x10   : > { %s2033_s19 = scalar_lea.vmem %s2230_s1, %s1635_s16  ;;  %s2042_s23 = scalar_lea.vmem %s2229_s0, %s1634_s20 }
  0x11   : > { %v1797_v0 = vld [vmem:[%s2033_s19] sm:$0xff]   ;;  %v1798_v1 = vld [vmem:[%s2033_s19 + $0x8] sm:$0xff]   ;;  %v1799_v2 = vld [vmem:[%s2033_s19 + $0x10] sm:$0xff]   ;;  %s1636_s26 = sshll.u32 %s2238_s12, 9 }
  0x12   : > { %1677 = vmatprep.subr.bf16.mxu0 %v1797_v0  ;;  %1757 = vmatprep.subr.bf16.mxu1 %v1797_v0  ;;  %v1800_v3 = vld [vmem:[%s2033_s19 + $0x18] sm:$0xff]   ;;  %v1805_v4 = vld [vmem:[%s2042_s23] sm:$0xff]   ;;  %v1802_v7 = vld [vmem:[%s2033_s19 + $0x28] sm:$0xff]   ;;  %s2102_s29 = scalar_lea.vmem %s2232_s3, %s1636_s26 }
  0x13   : > { %1678 = vmatpush3.bf16.msra.mxu0 %v1797_v0  ;;  %1765 = vmatpush3.bf16.msra.mxu1 %v1797_v0  ;;  %v1806_v5 = vld [vmem:[%s2042_s23 + $0x80] sm:$0xff]   ;;  %v1803_v8 = vld [vmem:[%s2033_s19 + $0x30] sm:$0xff]   ;;  %v1804_v9 = vld [vmem:[%s2033_s19 + $0x38] sm:$0xff]  }
  0x14   : > { %1679 = vmatprep.subr.bf16.mxu0 %v1798_v1  ;;  %1758 = vmatprep.subr.bf16.mxu1 %v1798_v1  ;;  %v1801_v6 = vld [vmem:[%s2033_s19 + $0x20] sm:$0xff]   ;;  %v1807_v10 = vld [vmem:[%s2042_s23 + $0x8] sm:$0xff]   ;;  %v1809_v12 = vld [vmem:[%s2042_s23 + $0x10] sm:$0xff]  }
  0x15   : > { %1693 = vmatprep.mubr.bf16.mxu0 %v1805_v4  ;;  %1725 = vmatprep.mubr.bf16.mxu1 %v1806_v5  ;;  %v1808_v11 = vld [vmem:[%s2042_s23 + $0x88] sm:$0xff]   ;;  %v1810_v13 = vld [vmem:[%s2042_s23 + $0x90] sm:$0xff]   ;;  %v1811_v14 = vld [vmem:[%s2042_s23 + $0x18] sm:$0xff]  }
  0x16   : > { %v1812_v15 = vld [vmem:[%s2042_s23 + $0x98] sm:$0xff]   ;;  %v1813_v16 = vld [vmem:[%s2042_s23 + $0x20] sm:$0xff]   ;;  %v1815_v18 = vld [vmem:[%s2042_s23 + $0x28] sm:$0xff]  }
  0x17   : > { %1680 = vmatpush3.bf16.msra.mxu0 %v1798_v1  ;;  %1766 = vmatpush3.bf16.msra.mxu1 %v1798_v1  ;;  %v1814_v17 = vld [vmem:[%s2042_s23 + $0xa0] sm:$0xff]   ;;  %v1816_v19 = vld [vmem:[%s2042_s23 + $0xa8] sm:$0xff]   ;;  %v1817_v20 = vld [vmem:[%s2042_s23 + $0x30] sm:$0xff]  }
  0x18   : > { %1681 = vmatprep.subr.bf16.mxu0 %v1799_v2  ;;  %1759 = vmatprep.subr.bf16.mxu1 %v1799_v2  ;;  %v1818_v21 = vld [vmem:[%s2042_s23 + $0xb0] sm:$0xff]   ;;  %v1819_v22 = vld [vmem:[%s2042_s23 + $0x38] sm:$0xff]   ;;  %v1821_v24 = vld [vmem:[%s2042_s23 + $0x40] sm:$0xff]  }
  0x19   : > { %v1820_v23 = vld [vmem:[%s2042_s23 + $0xb8] sm:$0xff]   ;;  %v1822_v25 = vld [vmem:[%s2042_s23 + $0xc0] sm:$0xff]   ;;  %v1823_v26 = vld [vmem:[%s2042_s23 + $0x48] sm:$0xff]  }
  0x1a   : > { %v1824_v27 = vld [vmem:[%s2042_s23 + $0xc8] sm:$0xff]   ;;  %v1825_v28 = vld [vmem:[%s2042_s23 + $0x50] sm:$0xff]   ;;  %v1827_v30 = vld [vmem:[%s2042_s23 + $0x58] sm:$0xff]  }
  0x1b   : > { %1682 = vmatpush3.bf16.msra.mxu0 %v1799_v2  ;;  %1767 = vmatpush3.bf16.msra.mxu1 %v1799_v2  ;;  %v1826_v29 = vld [vmem:[%s2042_s23 + $0xd0] sm:$0xff]   ;;  %v1828_v31 = vld [vmem:[%s2042_s23 + $0xd8] sm:$0xff]   ;;  %v1829_v32 = vld [vmem:[%s2042_s23 + $0x60] sm:$0xff]  }
  0x1c   : > { %1683 = vmatprep.subr.bf16.mxu0 %v1800_v3  ;;  %1760 = vmatprep.subr.bf16.mxu1 %v1800_v3  ;;  %v1830_v33 = vld [vmem:[%s2042_s23 + $0xe0] sm:$0xff]   ;;  %v1831_v34 = vld [vmem:[%s2042_s23 + $0x68] sm:$0xff]   ;;  %v1833_v36 = vld [vmem:[%s2042_s23 + $0x70] sm:$0xff]  }
  0x1d   : > { %v1832_v35 = vld [vmem:[%s2042_s23 + $0xe8] sm:$0xff]   ;;  %v1834_v37 = vld [vmem:[%s2042_s23 + $0xf0] sm:$0xff]   ;;  %v1835_v38 = vld [vmem:[%s2042_s23 + $0x78] sm:$0xff]  }
  0x1e   : > { %v1836_v39 = vld [vmem:[%s2042_s23 + $0xf8] sm:$0xff]  }
  0x1f   : > { %1684 = vmatpush3.bf16.msra.mxu0 %v1800_v3  ;;  %1768 = vmatpush3.bf16.msra.mxu1 %v1800_v3 }
  0x20   : > { %1685 = vmatprep.subr.bf16.mxu0 %v1801_v6  ;;  %1761 = vmatprep.subr.bf16.mxu1 %v1801_v6 }
  0x23   : > { %1686 = vmatpush3.bf16.msra.mxu0 %v1801_v6  ;;  %1769 = vmatpush3.bf16.msra.mxu1 %v1801_v6 }
  0x24   : > { %1687 = vmatprep.subr.bf16.mxu0 %v1802_v7  ;;  %1762 = vmatprep.subr.bf16.mxu1 %v1802_v7 }
  0x27   : > { %1688 = vmatpush3.bf16.msra.mxu0 %v1802_v7  ;;  %1770 = vmatpush3.bf16.msra.mxu1 %v1802_v7 }
  0x28   : > { %1689 = vmatprep.subr.bf16.mxu0 %v1803_v8  ;;  %1763 = vmatprep.subr.bf16.mxu1 %v1803_v8 }
  0x2b   : > { %1690 = vmatpush3.bf16.msra.mxu0 %v1803_v8  ;;  %1771 = vmatpush3.bf16.msra.mxu1 %v1803_v8 }
  0x2c   : > { %1691 = vmatprep.subr.bf16.mxu0 %v1804_v9  ;;  %1764 = vmatprep.subr.bf16.mxu1 %v1804_v9 }
  0x2f   : > { %1692 = vmatpush3.bf16.msra.mxu0 %v1804_v9  ;;  %1772 = vmatpush3.bf16.msra.mxu1 %v1804_v9 }
  0x32   : > { %1694 = vmatmul.mubr.bf16.vlgmr.msra.gmra.mrb[0].mxu0 %v1807_v10  ;;  %1726 = vmatmul.mubr.bf16.vlgmr.msra.gmra.mrb[0].mxu1 %v1808_v11 }
  0x33   : > { %1697 = vmatprep.mubr.bf16.mxu0 %v1809_v12  ;;  %1729 = vmatprep.mubr.bf16.mxu1 %v1810_v13 }
  0x3a   : > { %1698 = vmatmul.mubr.bf16.gmra.mrb[4].mxu0 %v1811_v14  ;;  %1730 = vmatmul.mubr.bf16.gmra.mrb[4].mxu1 %v1812_v15 }
  0x3b   : > { %1701 = vmatprep.mubr.bf16.mxu0 %v1813_v16  ;;  %1733 = vmatprep.mubr.bf16.mxu1 %v1814_v17 }
  0x42   : > { %1702 = vmatmul.mubr.bf16.gmra.mrb[8].mxu0 %v1815_v18  ;;  %1734 = vmatmul.mubr.bf16.gmra.mrb[8].mxu1 %v1816_v19 }
  0x43   : > { %1705 = vmatprep.mubr.bf16.mxu0 %v1817_v20  ;;  %1737 = vmatprep.mubr.bf16.mxu1 %v1818_v21 }
  0x4a   : > { %1706 = vmatmul.mubr.bf16.gmra.mrb[12].mxu0 %v1819_v22  ;;  %1738 = vmatmul.mubr.bf16.gmra.mrb[12].mxu1 %v1820_v23 }
  0x4b   : > { %1709 = vmatprep.mubr.bf16.mxu0 %v1821_v24  ;;  %1741 = vmatprep.mubr.bf16.mxu1 %v1822_v25 }
  0x52   : > { %1710 = vmatmul.mubr.bf16.gmra.mrb[16].mxu0 %v1823_v26  ;;  %1742 = vmatmul.mubr.bf16.gmra.mrb[16].mxu1 %v1824_v27 }
  0x53   : > { %1713 = vmatprep.mubr.bf16.mxu0 %v1825_v28  ;;  %1745 = vmatprep.mubr.bf16.mxu1 %v1826_v29 }
  0x5a   : > { %1714 = vmatmul.mubr.bf16.gmra.mrb[20].mxu0 %v1827_v30  ;;  %1746 = vmatmul.mubr.bf16.gmra.mrb[20].mxu1 %v1828_v31 }
  0x5b   : > { %1717 = vmatprep.mubr.bf16.mxu0 %v1829_v32  ;;  %1749 = vmatprep.mubr.bf16.mxu1 %v1830_v33 }
  0x62   : > { %1718 = vmatmul.mubr.bf16.gmra.mrb[24].mxu0 %v1831_v34  ;;  %1750 = vmatmul.mubr.bf16.gmra.mrb[24].mxu1 %v1832_v35 }
  0x63   : > { %1721 = vmatprep.mubr.bf16.mxu0 %v1833_v36  ;;  %1753 = vmatprep.mubr.bf16.mxu1 %v1834_v37 }
  0x6a   : > { %1722 = vmatmul.mubr.bf16.gmra.mrb[28].mxu0 %v1835_v38  ;;  %1754 = vmatmul.mubr.bf16.gmra.mrb[28].mxu1 %v1836_v39 }
 0x105   : > { %v1695_v41 = vpop.f32.mrb[0].mxu0  ;;  %v1727_v42 = vpop.f32.mrb[0].mxu1 }
 0x106   : > { %v1250_v43 = vadd.f32 %v1695_v41, %v2084_v40  ;;  %v1282_v44 = vadd.f32 %v1727_v42, %v2084_v40  ;;  %v791_v45 = vpop.f32.mrb[1].mxu0  ;;  %v919_v46 = vpop.f32.mrb[1].mxu1 }
 0x107   : > { %v1248_v47 = vadd.f32 %v2084_v40, %v791_v45  ;;  %v1280_v48 = vadd.f32 %v2084_v40, %v919_v46  ;;  %v1696_v49 = vpop.f32.mrb[2].mxu0  ;;  %v1728_v50 = vpop.f32.mrb[2].mxu1 }
 0x108   : > { %1837 = vtanh.f32 %v1250_v43  ;;  %v1251_v51 = vadd.f32 %v1696_v49, %v2084_v40  ;;  %v794_v52 = vpop.f32.mrb[3].mxu0  ;;  %v922_v53 = vpop.f32.mrb[3].mxu1  ;;  %v1283_v54 = vadd.f32 %v1728_v50, %v2084_v40 }
 0x109   : > { %1839 = vtanh.f32 %v1282_v44  ;;  %v1249_v55 = vadd.f32 %v2084_v40, %v794_v52  ;;  %v1281_v56 = vadd.f32 %v2084_v40, %v922_v53 }
 0x10a   : > { %1841 = vtanh.f32 %v1248_v47 }
 0x10b   : > { %1843 = vtanh.f32 %v1280_v48 }
 0x10c   : > { %1845 = vtanh.f32 %v1251_v51 }
 0x10d   : > { %1847 = vtanh.f32 %v1283_v54  ;;  %v1699_v57 = vpop.f32.mrb[4].mxu0  ;;  %v1731_v58 = vpop.f32.mrb[4].mxu1 }
 0x10e   : > { %1849 = vtanh.f32 %v1249_v55  ;;  %v1254_v59 = vadd.f32 %v1699_v57, %v2084_v40  ;;  %v1286_v60 = vadd.f32 %v1731_v58, %v2084_v40  ;;  %v807_v61 = vpop.f32.mrb[5].mxu0  ;;  %v935_v62 = vpop.f32.mrb[5].mxu1 }
 0x10f   : > { %1851 = vtanh.f32 %v1281_v56  ;;  %v1252_v63 = vadd.f32 %v2084_v40, %v807_v61  ;;  %v1284_v0 = vadd.f32 %v2084_v40, %v935_v62  ;;  %v1700_v1 = vpop.f32.mrb[6].mxu0  ;;  %v1732_v2 = vpop.f32.mrb[6].mxu1 }
 0x110   : > { %1853 = vtanh.f32 %v1254_v59  ;;  %v1255_v3 = vadd.f32 %v1700_v1, %v2084_v40  ;;  %v810_v4 = vpop.f32.mrb[7].mxu0  ;;  %v938_v5 = vpop.f32.mrb[7].mxu1  ;;  %v1287_v6 = vadd.f32 %v1732_v2, %v2084_v40 }
 0x111   : > { %1855 = vtanh.f32 %v1286_v60  ;;  %v1253_v8 = vadd.f32 %v2084_v40, %v810_v4  ;;  %v1285_v10 = vadd.f32 %v2084_v40, %v938_v5 }
 0x112   : > { %v1838_v7 = vpop.eup %1837  ;;  %1857 = vtanh.f32 %v1252_v63 }
 0x113   : > { %v1840_v9 = vpop.eup %1839  ;;  %1378 = vst [vmem:[%s2102_s29 + $0x10] sm:$0xff] %v1838_v7  ;;  %1859 = vtanh.f32 %v1284_v0 }
 0x114   : > { %v1842_v11 = vpop.eup %1841  ;;  %1410 = vst [vmem:[%s2102_s29 + $0x110] sm:$0xff] %v1840_v9  ;;  %1861 = vtanh.f32 %v1255_v3 }
 0x115   : > { %v1844_v12 = vpop.eup %1843  ;;  %1376 = vst [vmem:[%s2102_s29] sm:$0xff] %v1842_v11  ;;  %1863 = vtanh.f32 %v1287_v6  ;;  %v1703_v13 = vpop.f32.mrb[8].mxu0 }
 0x116   : > { %v1735_v14 = vpop.f32.mrb[8].mxu1  ;;  %v1846_v15 = vpop.eup %1845  ;;  %1408 = vst [vmem:[%s2102_s29 + $0x100] sm:$0xff] %v1844_v12  ;;  %1865 = vtanh.f32 %v1253_v8  ;;  %v1258_v16 = vadd.f32 %v1703_v13, %v2084_v40 }
 0x117   : > { %v1290_v17 = vadd.f32 %v1735_v14, %v2084_v40  ;;  %v823_v18 = vpop.f32.mrb[9].mxu0  ;;  %v951_v19 = vpop.f32.mrb[9].mxu1  ;;  %1379 = vst [vmem:[%s2102_s29 + $0x18] sm:$0xff] %v1846_v15  ;;  %1867 = vtanh.f32 %v1285_v10 }
 0x118   : > { %v1848_v20 = vpop.eup %1847  ;;  %v1256_v21 = vadd.f32 %v2084_v40, %v823_v18  ;;  %v1288_v22 = vadd.f32 %v2084_v40, %v951_v19  ;;  %v1704_v23 = vpop.f32.mrb[10].mxu0  ;;  %1869 = vtanh.f32 %v1258_v16 }
 0x119   : > { %v1736_v24 = vpop.f32.mrb[10].mxu1  ;;  %v1850_v25 = vpop.eup %1849  ;;  %1411 = vst [vmem:[%s2102_s29 + $0x118] sm:$0xff] %v1848_v20  ;;  %v1259_v26 = vadd.f32 %v1704_v23, %v2084_v40  ;;  %1871 = vtanh.f32 %v1290_v17 }
 0x11a   : > { %v826_v27 = vpop.f32.mrb[11].mxu0  ;;  %v954_v28 = vpop.f32.mrb[11].mxu1  ;;  %1377 = vst [vmem:[%s2102_s29 + $0x8] sm:$0xff] %v1850_v25  ;;  %v1291_v30 = vadd.f32 %v1736_v24, %v2084_v40  ;;  %1873 = vtanh.f32 %v1256_v21 }
 0x11b   : > { %v1852_v29 = vpop.eup %1851  ;;  %v1257_v32 = vadd.f32 %v2084_v40, %v826_v27  ;;  %1875 = vtanh.f32 %v1288_v22  ;;  %v1289_v34 = vadd.f32 %v2084_v40, %v954_v28 }
 0x11c   : > { %v1854_v31 = vpop.eup %1853  ;;  %1409 = vst [vmem:[%s2102_s29 + $0x108] sm:$0xff] %v1852_v29  ;;  %1877 = vtanh.f32 %v1259_v26 }
 0x11d   : > { %v1856_v33 = vpop.eup %1855  ;;  %1382 = vst [vmem:[%s2102_s29 + $0x30] sm:$0xff] %v1854_v31  ;;  %1879 = vtanh.f32 %v1291_v30  ;;  %v1707_v37 = vpop.f32.mrb[12].mxu0 }
 0x11e   : > { %v1858_v35 = vpop.eup %1857  ;;  %1414 = vst [vmem:[%s2102_s29 + $0x130] sm:$0xff] %v1856_v33  ;;  %v1739_v38 = vpop.f32.mrb[12].mxu1  ;;  %1881 = vtanh.f32 %v1257_v32  ;;  %v1262_v41 = vadd.f32 %v1707_v37, %v2084_v40 }
 0x11f   : > { %v1860_v36 = vpop.eup %1859  ;;  %1380 = vst [vmem:[%s2102_s29 + $0x20] sm:$0xff] %v1858_v35  ;;  %v1294_v42 = vadd.f32 %v1739_v38, %v2084_v40  ;;  %v839_v43 = vpop.f32.mrb[13].mxu0  ;;  %1883 = vtanh.f32 %v1289_v34 }
 0x120   : > { %v1862_v39 = vpop.eup %1861  ;;  %1412 = vst [vmem:[%s2102_s29 + $0x120] sm:$0xff] %v1860_v36  ;;  %v967_v44 = vpop.f32.mrb[13].mxu1  ;;  %v1260_v46 = vadd.f32 %v2084_v40, %v839_v43  ;;  %1885 = vtanh.f32 %v1262_v41 }
 0x121   : > { %v1864_v45 = vpop.eup %1863  ;;  %1383 = vst [vmem:[%s2102_s29 + $0x38] sm:$0xff] %v1862_v39  ;;  %v1292_v47 = vadd.f32 %v2084_v40, %v967_v44  ;;  %v1708_v48 = vpop.f32.mrb[14].mxu0  ;;  %1887 = vtanh.f32 %v1294_v42 }
 0x122   : > { %v1740_v49 = vpop.f32.mrb[14].mxu1  ;;  %v1866_v50 = vpop.eup %1865  ;;  %1415 = vst [vmem:[%s2102_s29 + $0x138] sm:$0xff] %v1864_v45  ;;  %v1263_v51 = vadd.f32 %v1708_v48, %v2084_v40  ;;  %1889 = vtanh.f32 %v1260_v46 }
 0x123   : > { %v842_v52 = vpop.f32.mrb[15].mxu0  ;;  %v970_v53 = vpop.f32.mrb[15].mxu1  ;;  %1381 = vst [vmem:[%s2102_s29 + $0x28] sm:$0xff] %v1866_v50  ;;  %v1295_v55 = vadd.f32 %v1740_v49, %v2084_v40  ;;  %1891 = vtanh.f32 %v1292_v47 }
 0x124   : > { %v1868_v54 = vpop.eup %1867  ;;  %v1261_v57 = vadd.f32 %v2084_v40, %v842_v52  ;;  %v1293_v59 = vadd.f32 %v2084_v40, %v970_v53  ;;  %1893 = vtanh.f32 %v1263_v51 }
 0x125   : > { %v1870_v56 = vpop.eup %1869  ;;  %1413 = vst [vmem:[%s2102_s29 + $0x128] sm:$0xff] %v1868_v54  ;;  %1895 = vtanh.f32 %v1295_v55  ;;  %v1711_v62 = vpop.f32.mrb[16].mxu0 }
 0x126   : > { %v1872_v58 = vpop.eup %1871  ;;  %1386 = vst [vmem:[%s2102_s29 + $0x50] sm:$0xff] %v1870_v56  ;;  %v1743_v63 = vpop.f32.mrb[16].mxu1  ;;  %1897 = vtanh.f32 %v1261_v57  ;;  %v1266_v1 = vadd.f32 %v1711_v62, %v2084_v40 }
 0x127   : > { %v1874_v60 = vpop.eup %1873  ;;  %1418 = vst [vmem:[%s2102_s29 + $0x150] sm:$0xff] %v1872_v58  ;;  %v1298_v2 = vadd.f32 %v1743_v63, %v2084_v40  ;;  %v855_v3 = vpop.f32.mrb[17].mxu0  ;;  %1899 = vtanh.f32 %v1293_v59 }
 0x128   : > { %v1876_v61 = vpop.eup %1875  ;;  %1384 = vst [vmem:[%s2102_s29 + $0x40] sm:$0xff] %v1874_v60  ;;  %v983_v4 = vpop.f32.mrb[17].mxu1  ;;  %v1264_v6 = vadd.f32 %v2084_v40, %v855_v3  ;;  %1901 = vtanh.f32 %v1266_v1 }
 0x129   : > { %v1878_v0 = vpop.eup %1877  ;;  %1416 = vst [vmem:[%s2102_s29 + $0x140] sm:$0xff] %v1876_v61  ;;  %v1296_v7 = vadd.f32 %v2084_v40, %v983_v4  ;;  %v1712_v8 = vpop.f32.mrb[18].mxu0  ;;  %1903 = vtanh.f32 %v1298_v2 }
 0x12a   : > { %v1880_v5 = vpop.eup %1879  ;;  %1387 = vst [vmem:[%s2102_s29 + $0x58] sm:$0xff] %v1878_v0  ;;  %v1744_v9 = vpop.f32.mrb[18].mxu1  ;;  %v1267_v11 = vadd.f32 %v1712_v8, %v2084_v40  ;;  %1905 = vtanh.f32 %v1264_v6 }
 0x12b   : > { %v1882_v10 = vpop.eup %1881  ;;  %1419 = vst [vmem:[%s2102_s29 + $0x158] sm:$0xff] %v1880_v5  ;;  %v858_v12 = vpop.f32.mrb[19].mxu0  ;;  %v1299_v15 = vadd.f32 %v1744_v9, %v2084_v40  ;;  %1907 = vtanh.f32 %v1296_v7 }
 0x12c   : > { %v986_v13 = vpop.f32.mrb[19].mxu1  ;;  %v1884_v14 = vpop.eup %1883  ;;  %1385 = vst [vmem:[%s2102_s29 + $0x48] sm:$0xff] %v1882_v10  ;;  %v1265_v17 = vadd.f32 %v2084_v40, %v858_v12  ;;  %1909 = vtanh.f32 %v1267_v11 }
 0x12d   : > { %v1886_v16 = vpop.eup %1885  ;;  %1417 = vst [vmem:[%s2102_s29 + $0x148] sm:$0xff] %v1884_v14  ;;  %v1297_v19 = vadd.f32 %v2084_v40, %v986_v13  ;;  %1911 = vtanh.f32 %v1299_v15  ;;  %v1715_v22 = vpop.f32.mrb[20].mxu0 }
 0x12e   : > { %v1888_v18 = vpop.eup %1887  ;;  %1390 = vst [vmem:[%s2102_s29 + $0x70] sm:$0xff] %v1886_v16  ;;  %v1747_v23 = vpop.f32.mrb[20].mxu1  ;;  %1913 = vtanh.f32 %v1265_v17  ;;  %v1270_v25 = vadd.f32 %v1715_v22, %v2084_v40 }
 0x12f   : > { %v1890_v20 = vpop.eup %1889  ;;  %1422 = vst [vmem:[%s2102_s29 + $0x170] sm:$0xff] %v1888_v18  ;;  %v1302_v26 = vadd.f32 %v1747_v23, %v2084_v40  ;;  %v871_v27 = vpop.f32.mrb[21].mxu0  ;;  %1915 = vtanh.f32 %v1297_v19 }
 0x130   : > { %v1892_v21 = vpop.eup %1891  ;;  %1388 = vst [vmem:[%s2102_s29 + $0x60] sm:$0xff] %v1890_v20  ;;  %v999_v28 = vpop.f32.mrb[21].mxu1  ;;  %v1268_v30 = vadd.f32 %v2084_v40, %v871_v27  ;;  %1917 = vtanh.f32 %v1270_v25 }
 0x131   : > { %v1894_v24 = vpop.eup %1893  ;;  %1420 = vst [vmem:[%s2102_s29 + $0x160] sm:$0xff] %v1892_v21  ;;  %v1300_v31 = vadd.f32 %v2084_v40, %v999_v28  ;;  %v1716_v32 = vpop.f32.mrb[22].mxu0  ;;  %1919 = vtanh.f32 %v1302_v26 }
 0x132   : > { %v1896_v29 = vpop.eup %1895  ;;  %1391 = vst [vmem:[%s2102_s29 + $0x78] sm:$0xff] %v1894_v24  ;;  %v1748_v33 = vpop.f32.mrb[22].mxu1  ;;  %v1271_v35 = vadd.f32 %v1716_v32, %v2084_v40  ;;  %1921 = vtanh.f32 %v1268_v30 }
 0x133   : > { %v1898_v34 = vpop.eup %1897  ;;  %1423 = vst [vmem:[%s2102_s29 + $0x178] sm:$0xff] %v1896_v29  ;;  %v874_v36 = vpop.f32.mrb[23].mxu0  ;;  %v1303_v39 = vadd.f32 %v1748_v33, %v2084_v40  ;;  %1923 = vtanh.f32 %v1300_v31 }
 0x134   : > { %v1002_v37 = vpop.f32.mrb[23].mxu1  ;;  %v1900_v38 = vpop.eup %1899  ;;  %1389 = vst [vmem:[%s2102_s29 + $0x68] sm:$0xff] %v1898_v34  ;;  %v1269_v42 = vadd.f32 %v2084_v40, %v874_v36  ;;  %1925 = vtanh.f32 %v1271_v35 }
 0x135   : > { %v1902_v41 = vpop.eup %1901  ;;  %1421 = vst [vmem:[%s2102_s29 + $0x168] sm:$0xff] %v1900_v38  ;;  %v1301_v44 = vadd.f32 %v2084_v40, %v1002_v37  ;;  %1927 = vtanh.f32 %v1303_v39  ;;  %v1719_v47 = vpop.f32.mrb[24].mxu0 }
 0x136   : > { %v1904_v43 = vpop.eup %1903  ;;  %1394 = vst [vmem:[%s2102_s29 + $0x90] sm:$0xff] %v1902_v41  ;;  %v1751_v48 = vpop.f32.mrb[24].mxu1  ;;  %1929 = vtanh.f32 %v1269_v42  ;;  %v1274_v50 = vadd.f32 %v1719_v47, %v2084_v40 }
 0x137   : > { %v1906_v45 = vpop.eup %1905  ;;  %1426 = vst [vmem:[%s2102_s29 + $0x190] sm:$0xff] %v1904_v43  ;;  %v1306_v51 = vadd.f32 %v1751_v48, %v2084_v40  ;;  %v887_v52 = vpop.f32.mrb[25].mxu0  ;;  %1931 = vtanh.f32 %v1301_v44 }
 0x138   : > { %v1908_v46 = vpop.eup %1907  ;;  %1392 = vst [vmem:[%s2102_s29 + $0x80] sm:$0xff] %v1906_v45  ;;  %v1015_v53 = vpop.f32.mrb[25].mxu1  ;;  %v1272_v55 = vadd.f32 %v2084_v40, %v887_v52  ;;  %1933 = vtanh.f32 %v1274_v50 }
 0x139   : > { %v1910_v49 = vpop.eup %1909  ;;  %1424 = vst [vmem:[%s2102_s29 + $0x180] sm:$0xff] %v1908_v46  ;;  %v1304_v56 = vadd.f32 %v2084_v40, %v1015_v53  ;;  %v1720_v57 = vpop.f32.mrb[26].mxu0  ;;  %1935 = vtanh.f32 %v1306_v51 }
 0x13a   : > { %v1912_v54 = vpop.eup %1911  ;;  %1395 = vst [vmem:[%s2102_s29 + $0x98] sm:$0xff] %v1910_v49  ;;  %v1752_v58 = vpop.f32.mrb[26].mxu1  ;;  %v1275_v60 = vadd.f32 %v1720_v57, %v2084_v40  ;;  %1937 = vtanh.f32 %v1272_v55 }
 0x13b   : > { %v1914_v59 = vpop.eup %1913  ;;  %1427 = vst [vmem:[%s2102_s29 + $0x198] sm:$0xff] %v1912_v54  ;;  %v890_v61 = vpop.f32.mrb[27].mxu0  ;;  %v1307_v0 = vadd.f32 %v1752_v58, %v2084_v40  ;;  %1939 = vtanh.f32 %v1304_v56 }
 0x13c   : > { %v1018_v62 = vpop.f32.mrb[27].mxu1  ;;  %v1916_v63 = vpop.eup %1915  ;;  %1393 = vst [vmem:[%s2102_s29 + $0x88] sm:$0xff] %v1914_v59  ;;  %v1273_v2 = vadd.f32 %v2084_v40, %v890_v61  ;;  %1941 = vtanh.f32 %v1275_v60 }
 0x13d   : > { %v1918_v1 = vpop.eup %1917  ;;  %1425 = vst [vmem:[%s2102_s29 + $0x188] sm:$0xff] %v1916_v63  ;;  %v1305_v4 = vadd.f32 %v2084_v40, %v1018_v62  ;;  %1943 = vtanh.f32 %v1307_v0  ;;  %v1723_v7 = vpop.f32.mrb[28].mxu0 }
 0x13e   : > { %v1920_v3 = vpop.eup %1919  ;;  %1398 = vst [vmem:[%s2102_s29 + $0xb0] sm:$0xff] %v1918_v1  ;;  %v1755_v8 = vpop.f32.mrb[28].mxu1  ;;  %1945 = vtanh.f32 %v1273_v2  ;;  %v1278_v10 = vadd.f32 %v1723_v7, %v2084_v40 }
 0x13f   : > { %v1922_v5 = vpop.eup %1921  ;;  %1430 = vst [vmem:[%s2102_s29 + $0x1b0] sm:$0xff] %v1920_v3  ;;  %v1310_v11 = vadd.f32 %v1755_v8, %v2084_v40  ;;  %v903_v12 = vpop.f32.mrb[29].mxu0  ;;  %1947 = vtanh.f32 %v1305_v4 }
 0x140   : > { %v1924_v6 = vpop.eup %1923  ;;  %1396 = vst [vmem:[%s2102_s29 + $0xa0] sm:$0xff] %v1922_v5  ;;  %v1031_v13 = vpop.f32.mrb[29].mxu1  ;;  %v1276_v15 = vadd.f32 %v2084_v40, %v903_v12  ;;  %1949 = vtanh.f32 %v1278_v10 }
 0x141   : > { %v1926_v9 = vpop.eup %1925  ;;  %1428 = vst [vmem:[%s2102_s29 + $0x1a0] sm:$0xff] %v1924_v6  ;;  %v1308_v16 = vadd.f32 %v2084_v40, %v1031_v13  ;;  %v1724_v17 = vpop.f32.mrb[30].mxu0  ;;  %1951 = vtanh.f32 %v1310_v11 }
 0x142   : > { %v1928_v14 = vpop.eup %1927  ;;  %1399 = vst [vmem:[%s2102_s29 + $0xb8] sm:$0xff] %v1926_v9  ;;  %v1756_v18 = vpop.f32.mrb[30].mxu1  ;;  %v1279_v20 = vadd.f32 %v1724_v17, %v2084_v40  ;;  %1953 = vtanh.f32 %v1276_v15 }
 0x143   : > { %v1930_v19 = vpop.eup %1929  ;;  %1431 = vst [vmem:[%s2102_s29 + $0x1b8] sm:$0xff] %v1928_v14  ;;  %v906_v21 = vpop.f32.mrb[31].mxu0  ;;  %v1311_v24 = vadd.f32 %v1756_v18, %v2084_v40  ;;  %1955 = vtanh.f32 %v1308_v16 }
 0x144   : > { %v1034_v22 = vpop.f32.mrb[31].mxu1  ;;  %v1932_v23 = vpop.eup %1931  ;;  %1397 = vst [vmem:[%s2102_s29 + $0xa8] sm:$0xff] %v1930_v19  ;;  %v1277_v26 = vadd.f32 %v2084_v40, %v906_v21  ;;  %1957 = vtanh.f32 %v1279_v20 }
 0x145   : > { %v1934_v25 = vpop.eup %1933  ;;  %1429 = vst [vmem:[%s2102_s29 + $0x1a8] sm:$0xff] %v1932_v23  ;;  %v1309_v28 = vadd.f32 %v2084_v40, %v1034_v22  ;;  %1959 = vtanh.f32 %v1311_v24 }
 0x146   : > { %v1936_v27 = vpop.eup %1935  ;;  %1402 = vst [vmem:[%s2102_s29 + $0xd0] sm:$0xff] %v1934_v25  ;;  %1961 = vtanh.f32 %v1277_v26 }
 0x147   : > { %v1938_v29 = vpop.eup %1937  ;;  %1434 = vst [vmem:[%s2102_s29 + $0x1d0] sm:$0xff] %v1936_v27  ;;  %1963 = vtanh.f32 %v1309_v28 }
 0x148   : > { %v1940_v30 = vpop.eup %1939  ;;  %1400 = vst [vmem:[%s2102_s29 + $0xc0] sm:$0xff] %v1938_v29 }
 0x149   : > { %v1942_v31 = vpop.eup %1941  ;;  %1432 = vst [vmem:[%s2102_s29 + $0x1c0] sm:$0xff] %v1940_v30 }
 0x14a   : > { %v1944_v32 = vpop.eup %1943  ;;  %1403 = vst [vmem:[%s2102_s29 + $0xd8] sm:$0xff] %v1942_v31 }
 0x14b   : > { %v1946_v40 = vpop.eup %1945  ;;  %1435 = vst [vmem:[%s2102_s29 + $0x1d8] sm:$0xff] %v1944_v32 }
 0x14c   : > { %v1948_v33 = vpop.eup %1947  ;;  %1401 = vst [vmem:[%s2102_s29 + $0xc8] sm:$0xff] %v1946_v40 }
 0x14d   : > { %v1950_v34 = vpop.eup %1949  ;;  %1433 = vst [vmem:[%s2102_s29 + $0x1c8] sm:$0xff] %v1948_v33 }
 0x14e   : > { %v1952_v35 = vpop.eup %1951  ;;  %1406 = vst [vmem:[%s2102_s29 + $0xf0] sm:$0xff] %v1950_v34 }
 0x14f   : > { %v1954_v36 = vpop.eup %1953  ;;  %1438 = vst [vmem:[%s2102_s29 + $0x1f0] sm:$0xff] %v1952_v35 }
 0x150   : > { %v1956_v37 = vpop.eup %1955  ;;  %1404 = vst [vmem:[%s2102_s29 + $0xe0] sm:$0xff] %v1954_v36 }
 0x151   : > { %v1958_v38 = vpop.eup %1957  ;;  %1436 = vst [vmem:[%s2102_s29 + $0x1e0] sm:$0xff] %v1956_v37 }
 0x152   : > { %v1960_v39 = vpop.eup %1959  ;;  %1407 = vst [vmem:[%s2102_s29 + $0xf8] sm:$0xff] %v1958_v38 }
 0x153   : > { %v1962_v41 = vpop.eup %1961  ;;  %1439 = vst [vmem:[%s2102_s29 + $0x1f8] sm:$0xff] %v1960_v39 }
 0x154   : > { %v1964_v42 = vpop.eup %1963  ;;  %1405 = vst [vmem:[%s2102_s29 + $0xe8] sm:$0xff] %v1962_v41 }
 0x155   : > { %1437 = vst [vmem:[%s2102_s29 + $0x1e8] sm:$0xff] %v1964_v42 }
 0x156 PF: > { %s13_s14 = sadd.s32 1, %s1987_s14   ;;  %s2233_s12 = smov %s1983_s13 }
 0x157   : > { %p10_p5 = scmp.ge.s32.totalorder %s13_s14, 6   ;;  %s2234_s13 = smov %s2236_s15 }
 0x159   :  { %12 = sbr.rel (!%p10_p5) target bundleno = 2 (0x2), region = 76 }

</bundles_post_ra>
